<compile_context>
chip_gen: v7x
topology: tpu7x:2x2x1
jax: 0.10.0
libtpu: 0.0.40
codegen_flags: <defaults>
</compile_context>

<pallas_src>
import math

import jax
import jax.numpy as jnp
from jax import lax
from jax.experimental import pallas as pl
from jax.experimental.pallas import tpu as pltpu


def _erf(v):
    # Abramowitz & Stegun 7.1.26 rational approximation (max abs err ~1.5e-7),
    # used for exact-GELU semantics (F.gelu default) inside the kernel.
    # TODO(synk): replace with a native erf lowering if/when Mosaic exposes one.
    a1, a2, a3, a4, a5 = 0.254829592, -0.284496736, 1.421413741, -1.453152027, 1.061405429
    p = 0.3275911
    av = jnp.abs(v)
    t = 1.0 / (1.0 + p * av)
    poly = ((((a5 * t + a4) * t + a3) * t + a2) * t + a1) * t
    y = 1.0 - poly * jnp.exp(-av * av)
    return jnp.where(v >= 0.0, y, -y)


def slstm_seq_kernel(
    x_ref, h0_ref, c0_ref, n0_ref, m0_ref,
    ln_w_ref, ln_b_ref, conv_w_ref, conv_b_ref,
    wzo_ref, bzo_ref, wif_ref, bif_ref, r_ref, rb_ref,
    g_ref, gt_ref, gn_w_ref, gn_b_ref,
    up_w_ref, up_b_ref, down_w_ref, down_b_ref,
    out_ref, ht_ref, ct_ref, nt_ref, mt_ref,
):
    f32 = jnp.float32
    t = pl.program_id(1)

    # t == 0: load the initial recurrent state into the resident output blocks
    # (they carry h/c/n/m across the "arbitrary" time axis of the grid).
    @pl.when(t == 0)
    def _():
        ht_ref[...] = h0_ref[...].astype(ht_ref.dtype)
        ct_ref[...] = c0_ref[...].astype(ct_ref.dtype)
        nt_ref[...] = n0_ref[...].astype(nt_ref.dtype)
        mt_ref[...] = m0_ref[...].astype(mt_ref.dtype)

    x = x_ref[0].astype(f32)                     # (bb, L)
    h_prev = ht_ref[...].astype(f32)
    c_prev = ct_ref[...].astype(f32)
    n_prev = nt_ref[...].astype(f32)
    m_prev = mt_ref[...].astype(f32)
    Bb, L = x.shape
    H = ht_ref.shape[-1]

    # ---- LayerNorm over input_size (eps=1e-5, affine) ----
    mu = jnp.mean(x, axis=-1, keepdims=True)
    var = jnp.mean((x - mu) ** 2, axis=-1, keepdims=True)
    x_norm = (x - mu) * lax.rsqrt(var + 1e-5)
    x_norm = x_norm * ln_w_ref[...] + ln_b_ref[...]

    # ---- Causal conv1d (kernel_size=4, left pad 3) via 4 shifted reads ----
    # y[:, t] = sum_{s=0..3} w[3 - s] * x_norm[:, t - s]   (zero for t < s)
    col = lax.broadcasted_iota(jnp.int32, (Bb, L), 1)
    x_conv = x_norm * conv_w_ref[0, 3]                     # s = 0 tap
    for s in range(1, 4):                                  # static unroll
        shifted = pltpu.roll(x_norm, shift=s, axis=1)      # XLU lane rotate
        shifted = jnp.where(col >= s, shifted, 0.0)        # kill wrap-around
        x_conv = x_conv + conv_w_ref[0, 3 - s] * shifted
    x_conv = x_conv + conv_b_ref[0, 0]
    x_conv = x_conv * jax.nn.sigmoid(x_conv)               # SiLU

    # ---- Fused gate matmuls: 3 wide MXU calls instead of 8 narrow ones ----
    # Weights may be bf16 (or f32 for checks); accumulation is always f32.
    def mm(a, w_ref, b_ref=None):
        y = jnp.dot(a.astype(w_ref.dtype), w_ref[...], preferred_element_type=f32)
        return y if b_ref is None else y + b_ref[...]

    rec = mm(h_prev, r_ref, rb_ref)       # (bb, 4H) = [Rz | Ri | Rf | Ro]
    zo = mm(x_norm, wzo_ref, bzo_ref)     # (bb, 2H) = [Wz | Wo]
    iff = mm(x_conv, wif_ref, bif_ref)    # (bb, 2H) = [Wi | Wf]

    z = jnp.tanh(zo[:, :H] + rec[:, :H])
    o = jax.nn.sigmoid(zo[:, H:] + rec[:, 3 * H:])
    i_tilde = iff[:, :H] + rec[:, H:2 * H]
    f_tilde = iff[:, H:] + rec[:, 2 * H:3 * H]

    # ---- sLSTM state update (stabilized exponential gating) ----
    m_t = jnp.maximum(f_tilde + m_prev, i_tilde)
    i_g = jnp.exp(i_tilde - m_t)
    f_g = jnp.exp(f_tilde + m_prev - m_t)
    c_t = f_g * c_prev + i_g * z
    n_t = f_g * n_prev + i_g
    # EUP reciprocal + one Newton step: the divide sits on the recurrent path,
    # so the raw approximation would otherwise compound over timesteps.
    r_n = pl.reciprocal(n_t, approx=True)
    r_n = r_n * (2.0 - n_t * r_n)
    h_t = o * c_t * r_n

    # ---- GroupNorm(num_heads) via precomputed indicator matmuls ----
    # G already carries the 1/head_size mean factor and is zero-padded to a
    # 128-lane multiple; two-pass variance kept for numerical robustness.
    g_mean = mm(h_t, g_ref)               # (bb, NHpad) group means
    mean_full = mm(g_mean, gt_ref)        # (bb, H)
    diff = h_t - mean_full
    g_var = mm(diff * diff, g_ref)        # (bb, NHpad) group variances (biased)
    var_full = mm(g_var, gt_ref)
    gn = diff * lax.rsqrt(var_full + 1e-5) * gn_w_ref[...] + gn_b_ref[...]

    # ---- Gated up/down projection (one fused up matmul), exact GELU ----
    up = mm(gn, up_w_ref, up_b_ref)       # (bb, 2*Ppad) = [left | right]
    P = up.shape[1] // 2                  # Ppad is a multiple of 128 (lane aligned)
    left = up[:, :P]
    right = up[:, P:]
    gated = 0.5 * right * (1.0 + _erf(right * (1.0 / math.sqrt(2.0))))
    down = mm(left * gated, down_w_ref, down_b_ref)

    out_ref[0] = (down + x).astype(out_ref.dtype)
    ht_ref[...] = h_t.astype(ht_ref.dtype)
    ct_ref[...] = c_t.astype(ct_ref.dtype)
    nt_ref[...] = n_t.astype(nt_ref.dtype)
    mt_ref[...] = m_t.astype(mt_ref.dtype)


def _round_up(x, m):
    return ((x + m - 1) // m) * m


def _vmem_budget_bytes():
    # Clamp the scoped-VMEM request to this generation's physical capacity
    # (v7x: 64 MiB per TensorCore) with headroom.
    cap = 64 * (1 << 20)
    try:
        info = pltpu.get_tpu_info()
        cap = int(getattr(info, "vmem_capacity_bytes", cap) or cap)
    except Exception:
        pass
    return min(int(0.85 * cap), 96 * (1 << 20))


def pack_slstm_params(p, *, num_heads, head_size, matmul_dtype=jnp.bfloat16, lane=128):
    """Pack / pad / cast the sLSTMBlock weights ONCE (hoisted out of the step).

    matmul_dtype is what the MXU sees (bf16 recommended on v5e/v6e/v7x; f32 only
    for strict checks). Biases and norm affine params stay f32 and are applied
    on the f32 accumulators.
    """
    proj = p["upl_w"].shape[1]
    proj_pad = _round_up(proj, lane)
    nh_pad = _round_up(num_heads, lane)
    wd = matmul_dtype

    def pad_cols(a, n):
        return a if a.shape[1] == n else jnp.pad(a, ((0, 0), (0, n - a.shape[1])))

    def pad_rows(a, n):
        return a if a.shape[0] == n else jnp.pad(a, ((0, n - a.shape[0]), (0, 0)))

    packed = {}
    packed["ln_w"] = p["ln_w"].astype(jnp.float32)
    packed["ln_b"] = p["ln_b"].astype(jnp.float32)
    packed["conv_w"] = p["conv_w"].astype(jnp.float32)
    packed["conv_b"] = p["conv_b"].astype(jnp.float32)

    packed["w_zo"] = jnp.concatenate([p["wz"], p["wo"]], axis=1).astype(wd)      # (L, 2H)
    packed["b_zo"] = jnp.concatenate([p["bz"], p["bo"]], axis=1).astype(jnp.float32)
    packed["w_if"] = jnp.concatenate([p["wi"], p["wf"]], axis=1).astype(wd)      # (L, 2H)
    packed["b_if"] = jnp.concatenate([p["bi"], p["bf"]], axis=1).astype(jnp.float32)
    packed["r"] = jnp.concatenate(
        [p["rz"], p["ri"], p["rf"], p["ro"]], axis=1).astype(wd)                 # (H, 4H)
    packed["rb"] = jnp.concatenate(
        [p["rbz"], p["rbi"], p["rbf"], p["rbo"]], axis=1).astype(jnp.float32)

    # GroupNorm indicator matrices: G carries the 1/head_size mean factor and is
    # zero-padded to a 128-lane multiple (extra group columns contribute zero).
    groups = jnp.repeat(jnp.arange(num_heads), head_size)                        # (H,)
    g = (groups[:, None] == jnp.arange(nh_pad)[None, :]).astype(jnp.float32)     # (H, NHpad)
    packed["g"] = (g / float(head_size)).astype(wd)
    packed["gt"] = jnp.transpose(g).astype(wd)                                   # (NHpad, H)
    packed["gn_w"] = p["gn_w"].astype(jnp.float32)
    packed["gn_b"] = p["gn_b"].astype(jnp.float32)

    # Up / down projection, proj zero-padded to a multiple of 128 lanes so the
    # left/right split is lane-aligned and the down-matmul K is a full tile.
    upl_w = pad_cols(p["upl_w"], proj_pad)
    upr_w = pad_cols(p["upr_w"], proj_pad)
    packed["up_w"] = jnp.concatenate([upl_w, upr_w], axis=1).astype(wd)          # (H, 2*Ppad)
    upl_b = pad_cols(p["upl_b"], proj_pad)
    upr_b = pad_cols(p["upr_b"], proj_pad)
    packed["up_b"] = jnp.concatenate([upl_b, upr_b], axis=1).astype(jnp.float32)
    packed["down_w"] = pad_rows(p["down_w"], proj_pad).astype(wd)                # (Ppad, L)
    packed["down_b"] = p["down_b"].astype(jnp.float32)
    return packed


def slstm_sequence_forward(x_seq, prev_state, packed, *, num_heads, head_size,
                           batch_block=None):
    """Run the sLSTM block over a (T, B, input_size) sequence in one pallas_call.

    packed:       output of pack_slstm_params (packed/padded/cast ONCE, reused).
    batch_block:  optional batch tile (must divide B; multiple of 8 sublanes at
                  production sizes). A grid with >=2 batch blocks is "parallel"
                  so v7x megacore can split it; each core then keeps its own
                  weight copy resident — only worth it since weights are reused
                  across all T steps.
    """
    T, B, L = x_seq.shape
    H = num_heads * head_size
    bb = B if batch_block is None else int(batch_block)
    assert B % bb == 0, "batch_block must divide batch"
    nb = B // bb
    grid = (nb, T)

    # Recurrent state stays f32 regardless of activation / weight dtype.
    h0, c0, n0, m0 = (jnp.asarray(s, jnp.float32) for s in prev_state)

    def seq_spec():
        return pl.BlockSpec((1, bb, L), lambda b, t: (t, b, 0))

    def state_spec():
        return pl.BlockSpec((bb, H), lambda b, t: (b, 0))

    def weight_spec(a):
        nd = a.ndim
        return pl.BlockSpec(a.shape, lambda b, t: (0,) * nd)

    smem = pl.BlockSpec(memory_space=pltpu.MemorySpace.SMEM)

    weight_names = ("ln_w", "ln_b", "w_zo", "b_zo", "w_if", "b_if", "r", "rb",
                    "g", "gt", "gn_w", "gn_b", "up_w", "up_b", "down_w", "down_b")

    items = [
        (x_seq, seq_spec()),
        (h0, state_spec()), (c0, state_spec()), (n0, state_spec()), (m0, state_spec()),
        (packed["ln_w"], weight_spec(packed["ln_w"])),
        (packed["ln_b"], weight_spec(packed["ln_b"])),
        (packed["conv_w"], smem), (packed["conv_b"], smem),
        (packed["w_zo"], weight_spec(packed["w_zo"])),
        (packed["b_zo"], weight_spec(packed["b_zo"])),
        (packed["w_if"], weight_spec(packed["w_if"])),
        (packed["b_if"], weight_spec(packed["b_if"])),
        (packed["r"], weight_spec(packed["r"])),
        (packed["rb"], weight_spec(packed["rb"])),
        (packed["g"], weight_spec(packed["g"])),
        (packed["gt"], weight_spec(packed["gt"])),
        (packed["gn_w"], weight_spec(packed["gn_w"])),
        (packed["gn_b"], weight_spec(packed["gn_b"])),
        (packed["up_w"], weight_spec(packed["up_w"])),
        (packed["up_b"], weight_spec(packed["up_b"])),
        (packed["down_w"], weight_spec(packed["down_w"])),
        (packed["down_b"], weight_spec(packed["down_b"])),
    ]
    arrays = [a for a, _ in items]
    in_specs = [s for _, s in items]

    out_shapes = (
        jax.ShapeDtypeStruct((T, B, L), x_seq.dtype),
        jax.ShapeDtypeStruct((B, H), jnp.float32),
        jax.ShapeDtypeStruct((B, H), jnp.float32),
        jax.ShapeDtypeStruct((B, H), jnp.float32),
        jax.ShapeDtypeStruct((B, H), jnp.float32),
    )
    out_specs = (seq_spec(), state_spec(), state_spec(), state_spec(), state_spec())

    # VMEM limit from per-block working set (not full-batch arrays), clamped to
    # this generation's physical capacity (v7x: 64 MiB per TensorCore).
    weight_bytes = sum(int(packed[n].size) * packed[n].dtype.itemsize
                       for n in weight_names)
    proj_pad = packed["up_w"].shape[1] // 2
    nh_pad = packed["g"].shape[1]
    per_step = bb * (2 * L + 8 * H) * 4                            # x/out + 8 state blocks
    act = bb * (12 * H + 4 * proj_pad + 2 * nh_pad + 8 * L) * 4    # activation headroom
    need = 2 * weight_bytes + 2 * per_step + act                   # 2x: default dbl buffers
    vmem_limit = int(min(_vmem_budget_bytes(), max(32 * (1 << 20), need)))

    fn = pl.pallas_call(
        slstm_seq_kernel,
        out_shape=out_shapes,
        grid=grid,
        in_specs=in_specs,
        out_specs=out_specs,
        # Alias the incoming h/c/n/m state to the h_t/c_t/n_t/m_t outputs.
        input_output_aliases={1: 1, 2: 2, 3: 3, 4: 4},
        compiler_params=pltpu.CompilerParams(
            dimension_semantics=("parallel", "arbitrary"),
            vmem_limit_bytes=vmem_limit),
    )
    out, h_t, c_t, n_t, m_t = fn(*arrays)
    return out, (h_t, c_t, n_t, m_t)


def init_params(key, input_size, head_size, num_heads, proj_factor=4.0 / 3.0):
    hidden = head_size * num_heads
    proj = int(hidden * proj_factor)
    ks = iter(jax.random.split(key, 40))

    def w(shape, scale=0.2):
        return (scale * jax.random.normal(next(ks), shape)).astype(jnp.float32)

    p = {}
    p["ln_w"] = jnp.ones((1, input_size), jnp.float32)
    p["ln_b"] = jnp.zeros((1, input_size), jnp.float32)
    p["conv_w"] = w((1, 4))
    p["conv_b"] = w((1, 1))
    for name, fan_in in [("wz", input_size), ("wi", input_size), ("wf", input_size), ("wo", input_size),
                         ("rz", hidden), ("ri", hidden), ("rf", hidden), ("ro", hidden)]:
        p[name] = w((fan_in, hidden))
    for name in ["bz", "bi", "bf", "bo", "rbz", "rbi", "rbf", "rbo"]:
        p[name] = w((1, hidden), 0.05)
    p["gn_w"] = jnp.ones((1, hidden), jnp.float32)
    p["gn_b"] = jnp.zeros((1, hidden), jnp.float32)
    p["upl_w"] = w((hidden, proj))
    p["upl_b"] = w((1, proj), 0.05)
    p["upr_w"] = w((hidden, proj))
    p["upr_b"] = w((1, proj), 0.05)
    p["down_w"] = w((proj, input_size))
    p["down_b"] = w((1, input_size), 0.05)
    return p


def slstm_step_ref(x, prev_state, p, num_heads, head_size):
    # Pure-JAX reference mirroring the PyTorch forward (single timestep).
    h_prev, c_prev, n_prev, m_prev = prev_state
    B, L = x.shape
    mu = jnp.mean(x, -1, keepdims=True)
    var = jnp.mean((x - mu) ** 2, -1, keepdims=True)
    xn = (x - mu) / jnp.sqrt(var + 1e-5) * p["ln_w"][0] + p["ln_b"][0]
    xp = jnp.pad(xn, ((0, 0), (3, 0)))
    w = p["conv_w"][0]
    xc = sum(w[k] * xp[:, k:k + L] for k in range(4)) + p["conv_b"][0, 0]
    xc = xc * jax.nn.sigmoid(xc)
    z = jnp.tanh(xn @ p["wz"] + p["bz"][0] + h_prev @ p["rz"] + p["rbz"][0])
    o = jax.nn.sigmoid(xn @ p["wo"] + p["bo"][0] + h_prev @ p["ro"] + p["rbo"][0])
    it = xc @ p["wi"] + p["bi"][0] + h_prev @ p["ri"] + p["rbi"][0]
    ft = xc @ p["wf"] + p["bf"][0] + h_prev @ p["rf"] + p["rbf"][0]
    m_t = jnp.maximum(ft + m_prev, it)
    ig = jnp.exp(it - m_t)
    fg = jnp.exp(ft + m_prev - m_t)
    c_t = fg * c_prev + ig * z
    n_t = fg * n_prev + ig
    h_t = o * c_t / n_t
    hr = h_t.reshape(B, num_heads, head_size)
    gm = jnp.mean(hr, -1, keepdims=True)
    gv = jnp.mean((hr - gm) ** 2, -1, keepdims=True)
    gn = ((hr - gm) / jnp.sqrt(gv + 1e-5)).reshape(B, -1) * p["gn_w"][0] + p["gn_b"][0]
    left = gn @ p["upl_w"] + p["upl_b"][0]
    right = gn @ p["upr_w"] + p["upr_b"][0]
    gated = jax.nn.gelu(right, approximate=False)
    out = (left * gated) @ p["down_w"] + p["down_b"][0] + x
    return out, (h_t, c_t, n_t, m_t)


def slstm_seq_ref(x_seq, state, p, num_heads, head_size):
    outs = []
    for t in range(x_seq.shape[0]):
        out, state = slstm_step_ref(x_seq[t], state, p, num_heads, head_size)
        outs.append(out)
    return jnp.stack(outs, axis=0), state


if __name__ == "__main__":
    T, B, input_size, head_size, num_heads = 6, 4, 16, 8, 4
    hidden = head_size * num_heads

    key = jax.random.PRNGKey(0)
    k_x, k_h, k_c, k_p = jax.random.split(key, 4)
    x_seq = (0.5 * jax.random.normal(k_x, (T, B, input_size))).astype(jnp.float32)
    h_prev = (0.1 * jax.random.normal(k_h, (B, hidden))).astype(jnp.float32)
    c_prev = (0.1 * jax.random.normal(k_c, (B, hidden))).astype(jnp.float32)
    n_prev = jnp.ones((B, hidden), jnp.float32)
    m_prev = jnp.zeros((B, hidden), jnp.float32)
    state = (h_prev, c_prev, n_prev, m_prev)
    params = init_params(k_p, input_size, head_size, num_heads)

    # Reference over the whole sequence (high-precision matmuls so the strict
    # f32 comparison is not dominated by the reference's default bf16 passes).
    with jax.default_matmul_precision("float32"):
        ref_out, (rh, rc, rn, rm) = slstm_seq_ref(x_seq, state, params, num_heads, head_size)
        ref_out, rh, rc, rn, rm = map(jax.block_until_ready, (ref_out, rh, rc, rn, rm))

    # ---- f32-weight path: correctness check (T-step rollout) ----
    packed_f32 = pack_slstm_params(params, num_heads=num_heads, head_size=head_size,
                                   matmul_dtype=jnp.float32)
    state_f32 = tuple(jnp.array(s) for s in state)   # fresh copies (state is aliased)
    out, (h_t, c_t, n_t, m_t) = slstm_sequence_forward(
        x_seq, state_f32, packed_f32, num_heads=num_heads, head_size=head_size)
    jax.block_until_ready((out, h_t, c_t, n_t, m_t))
    for got, want in [(out, ref_out), (h_t, rh), (c_t, rc), (n_t, rn), (m_t, rm)]:
        err = float(jnp.max(jnp.abs(got - want)))
        assert jnp.allclose(got, want, atol=5e-2, rtol=5e-2), err

    # ---- bf16-weight path (recommended default on v5e/v6e/v7x): loose drift
    # bound over the T-step rollout (recurrent h_prev is truncated each step
    # at the MXU input, so only a sanity bound is asserted here). ----
    packed_bf16 = pack_slstm_params(params, num_heads=num_heads, head_size=head_size,
                                    matmul_dtype=jnp.bfloat16)
    state_bf16 = tuple(jnp.array(s) for s in state)
    out_bf, (h_bf, c_bf, n_bf, m_bf) = slstm_sequence_forward(
        x_seq, state_bf16, packed_bf16, num_heads=num_heads, head_size=head_size)
    jax.block_until_ready((out_bf, h_bf, c_bf, n_bf, m_bf))
    assert bool(jnp.all(jnp.isfinite(out_bf)))
    assert jnp.allclose(out_bf, ref_out, atol=5e-1, rtol=5e-1)
    assert jnp.allclose(h_bf, rh, atol=5e-1, rtol=5e-1)

    print("KERNEL_OK")
</pallas_src>

<mosaic_0001>
module attributes {stable_mosaic.version = 11 : i64} {
  func.func @slstm_seq_kernel(%arg0: i32, %arg1: i32, %arg2: memref<1x4x16xf32, #tpu.memory_space<vmem>>, %arg3: memref<4x32xf32, #tpu.memory_space<vmem>>, %arg4: memref<4x32xf32, #tpu.memory_space<vmem>>, %arg5: memref<4x32xf32, #tpu.memory_space<vmem>>, %arg6: memref<4x32xf32, #tpu.memory_space<vmem>>, %arg7: memref<1x16xf32, #tpu.memory_space<vmem>>, %arg8: memref<1x16xf32, #tpu.memory_space<vmem>>, %arg9: memref<1x4xf32, #tpu.memory_space<smem>>, %arg10: memref<1x1xf32, #tpu.memory_space<smem>>, %arg11: memref<16x64xf32, #tpu.memory_space<vmem>>, %arg12: memref<1x64xf32, #tpu.memory_space<vmem>>, %arg13: memref<16x64xf32, #tpu.memory_space<vmem>>, %arg14: memref<1x64xf32, #tpu.memory_space<vmem>>, %arg15: memref<32x128xf32, #tpu.memory_space<vmem>>, %arg16: memref<1x128xf32, #tpu.memory_space<vmem>>, %arg17: memref<32x128xf32, #tpu.memory_space<vmem>>, %arg18: memref<128x32xf32, #tpu.memory_space<vmem>>, %arg19: memref<1x32xf32, #tpu.memory_space<vmem>>, %arg20: memref<1x32xf32, #tpu.memory_space<vmem>>, %arg21: memref<32x256xf32, #tpu.memory_space<vmem>>, %arg22: memref<1x256xf32, #tpu.memory_space<vmem>>, %arg23: memref<128x16xf32, #tpu.memory_space<vmem>>, %arg24: memref<1x16xf32, #tpu.memory_space<vmem>>, %arg25: memref<1x4x16xf32, #tpu.memory_space<vmem>>, %arg26: memref<4x32xf32, #tpu.memory_space<vmem>>, %arg27: memref<4x32xf32, #tpu.memory_space<vmem>>, %arg28: memref<4x32xf32, #tpu.memory_space<vmem>>, %arg29: memref<4x32xf32, #tpu.memory_space<vmem>>) attributes {dimension_semantics = [#tpu.dimension_semantics<parallel>, #tpu.dimension_semantics<arbitrary>], iteration_bounds = array<i64: 1, 6>, scalar_prefetch = 0 : i64, scratch_operands = 0 : i64, tpu.core_type = #tpu.core_type<tc>, window_params = [{transform_indices = @transform_0, window_bounds = array<i64: 1, 4, 16>}, {transform_indices = @transform_1, window_bounds = array<i64: 4, 32>}, {transform_indices = @transform_2, window_bounds = array<i64: 4, 32>}, {transform_indices = @transform_3, window_bounds = array<i64: 4, 32>}, {transform_indices = @transform_4, window_bounds = array<i64: 4, 32>}, {pipeline_mode = #tpu.pipeline_mode<synchronous>, transform_indices = @transform_5, window_bounds = array<i64: 1, 16>}, {pipeline_mode = #tpu.pipeline_mode<synchronous>, transform_indices = @transform_6, window_bounds = array<i64: 1, 16>}, {transform_indices = @transform_7, window_bounds = array<i64: 1, 4>}, {transform_indices = @transform_8, window_bounds = array<i64: 1, 1>}, {pipeline_mode = #tpu.pipeline_mode<synchronous>, transform_indices = @transform_9, window_bounds = array<i64: 16, 64>}, {pipeline_mode = #tpu.pipeline_mode<synchronous>, transform_indices = @transform_10, window_bounds = array<i64: 1, 64>}, {pipeline_mode = #tpu.pipeline_mode<synchronous>, transform_indices = @transform_11, window_bounds = array<i64: 16, 64>}, {pipeline_mode = #tpu.pipeline_mode<synchronous>, transform_indices = @transform_12, window_bounds = array<i64: 1, 64>}, {pipeline_mode = #tpu.pipeline_mode<synchronous>, transform_indices = @transform_13, window_bounds = array<i64: 32, 128>}, {pipeline_mode = #tpu.pipeline_mode<synchronous>, transform_indices = @transform_14, window_bounds = array<i64: 1, 128>}, {pipeline_mode = #tpu.pipeline_mode<synchronous>, transform_indices = @transform_15, window_bounds = array<i64: 32, 128>}, {pipeline_mode = #tpu.pipeline_mode<synchronous>, transform_indices = @transform_16, window_bounds = array<i64: 128, 32>}, {pipeline_mode = #tpu.pipeline_mode<synchronous>, transform_indices = @transform_17, window_bounds = array<i64: 1, 32>}, {pipeline_mode = #tpu.pipeline_mode<synchronous>, transform_indices = @transform_18, window_bounds = array<i64: 1, 32>}, {pipeline_mode = #tpu.pipeline_mode<synchronous>, transform_indices = @transform_19, window_bounds = array<i64: 32, 256>}, {pipeline_mode = #tpu.pipeline_mode<synchronous>, transform_indices = @transform_20, window_bounds = array<i64: 1, 256>}, {pipeline_mode = #tpu.pipeline_mode<synchronous>, transform_indices = @transform_21, window_bounds = array<i64: 128, 16>}, {pipeline_mode = #tpu.pipeline_mode<synchronous>, transform_indices = @transform_22, window_bounds = array<i64: 1, 16>}, {transform_indices = @transform_23, window_bounds = array<i64: 1, 4, 16>}, {transform_indices = @transform_24, window_bounds = array<i64: 4, 32>}, {transform_indices = @transform_25, window_bounds = array<i64: 4, 32>}, {transform_indices = @transform_26, window_bounds = array<i64: 4, 32>}, {transform_indices = @transform_27, window_bounds = array<i64: 4, 32>}]} {
    %c0_i32 = arith.constant 0 : i32
    %0 = arith.cmpi eq, %arg1, %c0_i32 : i32
    %1 = arith.extui %0 : i1 to i32
    %c0_i32_0 = arith.constant 0 : i32
    %2 = arith.cmpi ne, %1, %c0_i32_0 : i32
    scf.if %2 {
      %c0_103 = arith.constant 0 : index
      %c0_104 = arith.constant 0 : index
      %206 = vector.load %arg3[%c0_103, %c0_104] : memref<4x32xf32, #tpu.memory_space<vmem>>, vector<4x32xf32>
      %c0_105 = arith.constant 0 : index
      %c0_106 = arith.constant 0 : index
      %207 = vector.load %arg26[%c0_105, %c0_106] : memref<4x32xf32, #tpu.memory_space<vmem>>, vector<4x32xf32>
      tpu.vector_store %arg26[%c0_105, %c0_106], %206 {strides = array<i32>} : memref<4x32xf32, #tpu.memory_space<vmem>>, vector<4x32xf32>,
      %c0_107 = arith.constant 0 : index
      %c0_108 = arith.constant 0 : index
      %208 = vector.load %arg4[%c0_107, %c0_108] : memref<4x32xf32, #tpu.memory_space<vmem>>, vector<4x32xf32>
      %c0_109 = arith.constant 0 : index
      %c0_110 = arith.constant 0 : index
      %209 = vector.load %arg27[%c0_109, %c0_110] : memref<4x32xf32, #tpu.memory_space<vmem>>, vector<4x32xf32>
      tpu.vector_store %arg27[%c0_109, %c0_110], %208 {strides = array<i32>} : memref<4x32xf32, #tpu.memory_space<vmem>>, vector<4x32xf32>,
      %c0_111 = arith.constant 0 : index
      %c0_112 = arith.constant 0 : index
      %210 = vector.load %arg5[%c0_111, %c0_112] : memref<4x32xf32, #tpu.memory_space<vmem>>, vector<4x32xf32>
      %c0_113 = arith.constant 0 : index
      %c0_114 = arith.constant 0 : index
      %211 = vector.load %arg28[%c0_113, %c0_114] : memref<4x32xf32, #tpu.memory_space<vmem>>, vector<4x32xf32>
      tpu.vector_store %arg28[%c0_113, %c0_114], %210 {strides = array<i32>} : memref<4x32xf32, #tpu.memory_space<vmem>>, vector<4x32xf32>,
      %c0_115 = arith.constant 0 : index
      %c0_116 = arith.constant 0 : index
      %212 = vector.load %arg6[%c0_115, %c0_116] : memref<4x32xf32, #tpu.memory_space<vmem>>, vector<4x32xf32>
      %c0_117 = arith.constant 0 : index
      %c0_118 = arith.constant 0 : index
      %213 = vector.load %arg29[%c0_117, %c0_118] : memref<4x32xf32, #tpu.memory_space<vmem>>, vector<4x32xf32>
      tpu.vector_store %arg29[%c0_117, %c0_118], %212 {strides = array<i32>} : memref<4x32xf32, #tpu.memory_space<vmem>>, vector<4x32xf32>,
    } else {
    }
    %c0 = arith.constant 0 : index
    %c0_1 = arith.constant 0 : index
    %c0_2 = arith.constant 0 : index
    %3 = vector.load %arg2[%c0, %c0_1, %c0_2] : memref<1x4x16xf32, #tpu.memory_space<vmem>>, vector<1x4x16xf32>
    %4 = vector.shape_cast %3 : vector<1x4x16xf32> to vector<4x16xf32>
    %c0_3 = arith.constant 0 : index
    %c0_4 = arith.constant 0 : index
    %5 = vector.load %arg26[%c0_3, %c0_4] : memref<4x32xf32, #tpu.memory_space<vmem>>, vector<4x32xf32>
    %c0_5 = arith.constant 0 : index
    %c0_6 = arith.constant 0 : index
    %6 = vector.load %arg27[%c0_5, %c0_6] : memref<4x32xf32, #tpu.memory_space<vmem>>, vector<4x32xf32>
    %c0_7 = arith.constant 0 : index
    %c0_8 = arith.constant 0 : index
    %7 = vector.load %arg28[%c0_7, %c0_8] : memref<4x32xf32, #tpu.memory_space<vmem>>, vector<4x32xf32>
    %c0_9 = arith.constant 0 : index
    %c0_10 = arith.constant 0 : index
    %8 = vector.load %arg29[%c0_9, %c0_10] : memref<4x32xf32, #tpu.memory_space<vmem>>, vector<4x32xf32>
    %cst = arith.constant dense<0.000000e+00> : vector<4xf32>
    %9 = vector.multi_reduction <add>, %4, %cst [1] : vector<4x16xf32> to vector<4xf32>
    %10 = vector.shape_cast %9 : vector<4xf32> to vector<4x1xf32>
    %cst_11 = arith.constant 1.600000e+01 : f32
    %11 = vector.broadcast %cst_11 : f32 to vector<4x1xf32>
    %12 = arith.divf %10, %11 : vector<4x1xf32>
    %13 = vector.broadcast %12 : vector<4x1xf32> to vector<4x16xf32>
    %14 = arith.subf %4, %13 : vector<4x16xf32>
    %15 = arith.mulf %14, %14 : vector<4x16xf32>
    %cst_12 = arith.constant dense<0.000000e+00> : vector<4xf32>
    %16 = vector.multi_reduction <add>, %15, %cst_12 [1] : vector<4x16xf32> to vector<4xf32>
    %17 = vector.shape_cast %16 : vector<4xf32> to vector<4x1xf32>
    %cst_13 = arith.constant 1.600000e+01 : f32
    %18 = vector.broadcast %cst_13 : f32 to vector<4x1xf32>
    %19 = arith.divf %17, %18 : vector<4x1xf32>
    %20 = vector.broadcast %12 : vector<4x1xf32> to vector<4x16xf32>
    %21 = arith.subf %4, %20 : vector<4x16xf32>
    %cst_14 = arith.constant 9.99999974E-6 : f32
    %22 = vector.broadcast %cst_14 : f32 to vector<4x1xf32>
    %23 = arith.addf %19, %22 : vector<4x1xf32>
    %24 = math.rsqrt %23 : vector<4x1xf32>
    %25 = vector.broadcast %24 : vector<4x1xf32> to vector<4x16xf32>
    %26 = arith.mulf %21, %25 : vector<4x16xf32>
    %c0_15 = arith.constant 0 : index
    %c0_16 = arith.constant 0 : index
    %27 = vector.load %arg7[%c0_15, %c0_16] : memref<1x16xf32, #tpu.memory_space<vmem>>, vector<1x16xf32>
    %28 = vector.broadcast %27 : vector<1x16xf32> to vector<4x16xf32>
    %29 = arith.mulf %26, %28 : vector<4x16xf32>
    %c0_17 = arith.constant 0 : index
    %c0_18 = arith.constant 0 : index
    %30 = vector.load %arg8[%c0_17, %c0_18] : memref<1x16xf32, #tpu.memory_space<vmem>>, vector<1x16xf32>
    %31 = vector.broadcast %30 : vector<1x16xf32> to vector<4x16xf32>
    %32 = arith.addf %29, %31 : vector<4x16xf32>
    %33 = tpu.iota {dimensions = array<i32: 1>} : vector<4x16xi32>
    %c0_19 = arith.constant 0 : index
    %c3 = arith.constant 3 : index
    %34 = memref.load %arg9[%c0_19, %c3] : memref<1x4xf32, #tpu.memory_space<smem>>
    %35 = vector.broadcast %34 : f32 to vector<4x16xf32>
    %36 = arith.mulf %32, %35 : vector<4x16xf32>
    %c1_i32 = arith.constant 1 : i32
    %37 = tpu.dynamic_rotate %32 by %c1_i32 dim 1 : vector<4x16xf32>, i32 -> vector<4x16xf32>
    %c1_i32_20 = arith.constant 1 : i32
    %38 = vector.broadcast %c1_i32_20 : i32 to vector<4x16xi32>
    %39 = arith.cmpi sge, %33, %38 : vector<4x16xi32>
    %cst_21 = arith.constant 0.000000e+00 : f32
    %40 = vector.broadcast %cst_21 : f32 to vector<4x16xf32>
    %41 = arith.select %39, %37, %40 : vector<4x16xi1>, vector<4x16xf32>
    %c0_22 = arith.constant 0 : index
    %c2 = arith.constant 2 : index
    %42 = memref.load %arg9[%c0_22, %c2] : memref<1x4xf32, #tpu.memory_space<smem>>
    %43 = vector.broadcast %42 : f32 to vector<4x16xf32>
    %44 = arith.mulf %43, %41 : vector<4x16xf32>
    %45 = arith.addf %36, %44 : vector<4x16xf32>
    %c2_i32 = arith.constant 2 : i32
    %46 = tpu.dynamic_rotate %32 by %c2_i32 dim 1 : vector<4x16xf32>, i32 -> vector<4x16xf32>
    %c2_i32_23 = arith.constant 2 : i32
    %47 = vector.broadcast %c2_i32_23 : i32 to vector<4x16xi32>
    %48 = arith.cmpi sge, %33, %47 : vector<4x16xi32>
    %cst_24 = arith.constant 0.000000e+00 : f32
    %49 = vector.broadcast %cst_24 : f32 to vector<4x16xf32>
    %50 = arith.select %48, %46, %49 : vector<4x16xi1>, vector<4x16xf32>
    %c0_25 = arith.constant 0 : index
    %c1 = arith.constant 1 : index
    %51 = memref.load %arg9[%c0_25, %c1] : memref<1x4xf32, #tpu.memory_space<smem>>
    %52 = vector.broadcast %51 : f32 to vector<4x16xf32>
    %53 = arith.mulf %52, %50 : vector<4x16xf32>
    %54 = arith.addf %45, %53 : vector<4x16xf32>
    %c3_i32 = arith.constant 3 : i32
    %55 = tpu.dynamic_rotate %32 by %c3_i32 dim 1 : vector<4x16xf32>, i32 -> vector<4x16xf32>
    %c3_i32_26 = arith.constant 3 : i32
    %56 = vector.broadcast %c3_i32_26 : i32 to vector<4x16xi32>
    %57 = arith.cmpi sge, %33, %56 : vector<4x16xi32>
    %cst_27 = arith.constant 0.000000e+00 : f32
    %58 = vector.broadcast %cst_27 : f32 to vector<4x16xf32>
    %59 = arith.select %57, %55, %58 : vector<4x16xi1>, vector<4x16xf32>
    %c0_28 = arith.constant 0 : index
    %c0_29 = arith.constant 0 : index
    %60 = memref.load %arg9[%c0_28, %c0_29] : memref<1x4xf32, #tpu.memory_space<smem>>
    %61 = vector.broadcast %60 : f32 to vector<4x16xf32>
    %62 = arith.mulf %61, %59 : vector<4x16xf32>
    %63 = arith.addf %54, %62 : vector<4x16xf32>
    %c0_30 = arith.constant 0 : index
    %c0_31 = arith.constant 0 : index
    %64 = memref.load %arg10[%c0_30, %c0_31] : memref<1x1xf32, #tpu.memory_space<smem>>
    %65 = vector.broadcast %64 : f32 to vector<4x16xf32>
    %66 = arith.addf %63, %65 : vector<4x16xf32>
    %67 = arith.negf %66 : vector<4x16xf32>
    %68 = math.exp %67 : vector<4x16xf32>
    %cst_32 = arith.constant 1.000000e+00 : f32
    %69 = vector.broadcast %cst_32 : f32 to vector<4x16xf32>
    %70 = arith.addf %69, %68 : vector<4x16xf32>
    %71 = arith.divf %69, %70 : vector<4x16xf32>
    %72 = arith.mulf %66, %71 : vector<4x16xf32>
    %c0_33 = arith.constant 0 : index
    %c0_34 = arith.constant 0 : index
    %73 = vector.load %arg15[%c0_33, %c0_34] : memref<32x128xf32, #tpu.memory_space<vmem>>, vector<32x128xf32>
    %cst_35 = arith.constant dense<0.000000e+00> : vector<4x128xf32>
    %74 = tpu.matmul %5, %73, %cst_35 {dimension_numbers = #tpu.dot_dimension_numbers<[1], [0], [0], [1], [0, 0, 1, 1], [], []>} : vector<4x32xf32>, vector<32x128xf32>, vector<4x128xf32> -> vector<4x128xf32>
    %c0_36 = arith.constant 0 : index
    %c0_37 = arith.constant 0 : index
    %75 = vector.load %arg16[%c0_36, %c0_37] : memref<1x128xf32, #tpu.memory_space<vmem>>, vector<1x128xf32>
    %76 = vector.broadcast %75 : vector<1x128xf32> to vector<4x128xf32>
    %77 = arith.addf %74, %76 : vector<4x128xf32>
    %c0_38 = arith.constant 0 : index
    %c0_39 = arith.constant 0 : index
    %78 = vector.load %arg11[%c0_38, %c0_39] : memref<16x64xf32, #tpu.memory_space<vmem>>, vector<16x64xf32>
    %cst_40 = arith.constant dense<0.000000e+00> : vector<4x64xf32>
    %79 = tpu.matmul %32, %78, %cst_40 {dimension_numbers = #tpu.dot_dimension_numbers<[1], [0], [0], [1], [0, 0, 1, 1], [], []>} : vector<4x16xf32>, vector<16x64xf32>, vector<4x64xf32> -> vector<4x64xf32>
    %c0_41 = arith.constant 0 : index
    %c0_42 = arith.constant 0 : index
    %80 = vector.load %arg12[%c0_41, %c0_42] : memref<1x64xf32, #tpu.memory_space<vmem>>, vector<1x64xf32>
    %81 = vector.broadcast %80 : vector<1x64xf32> to vector<4x64xf32>
    %82 = arith.addf %79, %81 : vector<4x64xf32>
    %c0_43 = arith.constant 0 : index
    %c0_44 = arith.constant 0 : index
    %83 = vector.load %arg13[%c0_43, %c0_44] : memref<16x64xf32, #tpu.memory_space<vmem>>, vector<16x64xf32>
    %cst_45 = arith.constant dense<0.000000e+00> : vector<4x64xf32>
    %84 = tpu.matmul %72, %83, %cst_45 {dimension_numbers = #tpu.dot_dimension_numbers<[1], [0], [0], [1], [0, 0, 1, 1], [], []>} : vector<4x16xf32>, vector<16x64xf32>, vector<4x64xf32> -> vector<4x64xf32>
    %c0_46 = arith.constant 0 : index
    %c0_47 = arith.constant 0 : index
    %85 = vector.load %arg14[%c0_46, %c0_47] : memref<1x64xf32, #tpu.memory_space<vmem>>, vector<1x64xf32>
    %86 = vector.broadcast %85 : vector<1x64xf32> to vector<4x64xf32>
    %87 = arith.addf %84, %86 : vector<4x64xf32>
    %88 = vector.extract_strided_slice %82 {offsets = [0, 0], sizes = [4, 32], strides = [1, 1]} : vector<4x64xf32> to vector<4x32xf32>
    %89 = vector.extract_strided_slice %77 {offsets = [0, 0], sizes = [4, 32], strides = [1, 1]} : vector<4x128xf32> to vector<4x32xf32>
    %90 = arith.addf %88, %89 : vector<4x32xf32>
    %91 = math.tanh %90 : vector<4x32xf32>
    %92 = vector.extract_strided_slice %82 {offsets = [0, 32], sizes = [4, 32], strides = [1, 1]} : vector<4x64xf32> to vector<4x32xf32>
    %93 = vector.extract_strided_slice %77 {offsets = [0, 96], sizes = [4, 32], strides = [1, 1]} : vector<4x128xf32> to vector<4x32xf32>
    %94 = arith.addf %92, %93 : vector<4x32xf32>
    %95 = arith.negf %94 : vector<4x32xf32>
    %96 = math.exp %95 : vector<4x32xf32>
    %cst_48 = arith.constant 1.000000e+00 : f32
    %97 = vector.broadcast %cst_48 : f32 to vector<4x32xf32>
    %98 = arith.addf %97, %96 : vector<4x32xf32>
    %99 = arith.divf %97, %98 : vector<4x32xf32>
    %100 = vector.extract_strided_slice %87 {offsets = [0, 0], sizes = [4, 32], strides = [1, 1]} : vector<4x64xf32> to vector<4x32xf32>
    %101 = vector.extract_strided_slice %77 {offsets = [0, 32], sizes = [4, 32], strides = [1, 1]} : vector<4x128xf32> to vector<4x32xf32>
    %102 = arith.addf %100, %101 : vector<4x32xf32>
    %103 = vector.extract_strided_slice %87 {offsets = [0, 32], sizes = [4, 32], strides = [1, 1]} : vector<4x64xf32> to vector<4x32xf32>
    %104 = vector.extract_strided_slice %77 {offsets = [0, 64], sizes = [4, 32], strides = [1, 1]} : vector<4x128xf32> to vector<4x32xf32>
    %105 = arith.addf %103, %104 : vector<4x32xf32>
    %106 = arith.addf %105, %8 : vector<4x32xf32>
    %107 = arith.maximumf %106, %102 : vector<4x32xf32>
    %108 = arith.subf %102, %107 : vector<4x32xf32>
    %109 = math.exp %108 : vector<4x32xf32>
    %110 = arith.addf %105, %8 : vector<4x32xf32>
    %111 = arith.subf %110, %107 : vector<4x32xf32>
    %112 = math.exp %111 : vector<4x32xf32>
    %113 = arith.mulf %112, %6 : vector<4x32xf32>
    %114 = arith.mulf %109, %91 : vector<4x32xf32>
    %115 = arith.addf %113, %114 : vector<4x32xf32>
    %116 = arith.mulf %112, %7 : vector<4x32xf32>
    %117 = arith.addf %116, %109 : vector<4x32xf32>
    %118 = tpu.reciprocal %117 {approx = true} : vector<4x32xf32> -> vector<4x32xf32>
    %119 = arith.mulf %117, %118 : vector<4x32xf32>
    %cst_49 = arith.constant 2.000000e+00 : f32
    %120 = vector.broadcast %cst_49 : f32 to vector<4x32xf32>
    %121 = arith.subf %120, %119 : vector<4x32xf32>
    %122 = arith.mulf %118, %121 : vector<4x32xf32>
    %123 = arith.mulf %99, %115 : vector<4x32xf32>
    %124 = arith.mulf %123, %122 : vector<4x32xf32>
    %c0_50 = arith.constant 0 : index
    %c0_51 = arith.constant 0 : index
    %125 = vector.load %arg17[%c0_50, %c0_51] : memref<32x128xf32, #tpu.memory_space<vmem>>, vector<32x128xf32>
    %cst_52 = arith.constant dense<0.000000e+00> : vector<4x128xf32>
    %126 = tpu.matmul %124, %125, %cst_52 {dimension_numbers = #tpu.dot_dimension_numbers<[1], [0], [0], [1], [0, 0, 1, 1], [], []>} : vector<4x32xf32>, vector<32x128xf32>, vector<4x128xf32> -> vector<4x128xf32>
    %c0_53 = arith.constant 0 : index
    %c0_54 = arith.constant 0 : index
    %127 = vector.load %arg18[%c0_53, %c0_54] : memref<128x32xf32, #tpu.memory_space<vmem>>, vector<128x32xf32>
    %cst_55 = arith.constant dense<0.000000e+00> : vector<4x32xf32>
    %128 = tpu.matmul %126, %127, %cst_55 {dimension_numbers = #tpu.dot_dimension_numbers<[1], [0], [0], [1], [0, 0, 1, 1], [], []>} : vector<4x128xf32>, vector<128x32xf32>, vector<4x32xf32> -> vector<4x32xf32>
    %129 = arith.subf %124, %128 : vector<4x32xf32>
    %130 = arith.mulf %129, %129 : vector<4x32xf32>
    %c0_56 = arith.constant 0 : index
    %c0_57 = arith.constant 0 : index
    %131 = vector.load %arg17[%c0_56, %c0_57] : memref<32x128xf32, #tpu.memory_space<vmem>>, vector<32x128xf32>
    %cst_58 = arith.constant dense<0.000000e+00> : vector<4x128xf32>
    %132 = tpu.matmul %130, %131, %cst_58 {dimension_numbers = #tpu.dot_dimension_numbers<[1], [0], [0], [1], [0, 0, 1, 1], [], []>} : vector<4x32xf32>, vector<32x128xf32>, vector<4x128xf32> -> vector<4x128xf32>
    %c0_59 = arith.constant 0 : index
    %c0_60 = arith.constant 0 : index
    %133 = vector.load %arg18[%c0_59, %c0_60] : memref<128x32xf32, #tpu.memory_space<vmem>>, vector<128x32xf32>
    %cst_61 = arith.constant dense<0.000000e+00> : vector<4x32xf32>
    %134 = tpu.matmul %132, %133, %cst_61 {dimension_numbers = #tpu.dot_dimension_numbers<[1], [0], [0], [1], [0, 0, 1, 1], [], []>} : vector<4x128xf32>, vector<128x32xf32>, vector<4x32xf32> -> vector<4x32xf32>
    %cst_62 = arith.constant 9.99999974E-6 : f32
    %135 = vector.broadcast %cst_62 : f32 to vector<4x32xf32>
    %136 = arith.addf %134, %135 : vector<4x32xf32>
    %137 = math.rsqrt %136 : vector<4x32xf32>
    %138 = arith.mulf %129, %137 : vector<4x32xf32>
    %c0_63 = arith.constant 0 : index
    %c0_64 = arith.constant 0 : index
    %139 = vector.load %arg19[%c0_63, %c0_64] : memref<1x32xf32, #tpu.memory_space<vmem>>, vector<1x32xf32>
    %140 = vector.broadcast %139 : vector<1x32xf32> to vector<4x32xf32>
    %141 = arith.mulf %138, %140 : vector<4x32xf32>
    %c0_65 = arith.constant 0 : index
    %c0_66 = arith.constant 0 : index
    %142 = vector.load %arg20[%c0_65, %c0_66] : memref<1x32xf32, #tpu.memory_space<vmem>>, vector<1x32xf32>
    %143 = vector.broadcast %142 : vector<1x32xf32> to vector<4x32xf32>
    %144 = arith.addf %141, %143 : vector<4x32xf32>
    %c0_67 = arith.constant 0 : index
    %c0_68 = arith.constant 0 : index
    %145 = vector.load %arg21[%c0_67, %c0_68] : memref<32x256xf32, #tpu.memory_space<vmem>>, vector<32x256xf32>
    %cst_69 = arith.constant dense<0.000000e+00> : vector<4x256xf32>
    %146 = tpu.matmul %144, %145, %cst_69 {dimension_numbers = #tpu.dot_dimension_numbers<[1], [0], [0], [1], [0, 0, 1, 1], [], []>} : vector<4x32xf32>, vector<32x256xf32>, vector<4x256xf32> -> vector<4x256xf32>
    %c0_70 = arith.constant 0 : index
    %c0_71 = arith.constant 0 : index
    %147 = vector.load %arg22[%c0_70, %c0_71] : memref<1x256xf32, #tpu.memory_space<vmem>>, vector<1x256xf32>
    %148 = vector.broadcast %147 : vector<1x256xf32> to vector<4x256xf32>
    %149 = arith.addf %146, %148 : vector<4x256xf32>
    %150 = vector.extract_strided_slice %149 {offsets = [0, 0], sizes = [4, 128], strides = [1, 1]} : vector<4x256xf32> to vector<4x128xf32>
    %151 = vector.extract_strided_slice %149 {offsets = [0, 128], sizes = [4, 128], strides = [1, 1]} : vector<4x256xf32> to vector<4x128xf32>
    %cst_72 = arith.constant 5.000000e-01 : f32
    %152 = vector.broadcast %cst_72 : f32 to vector<4x128xf32>
    %153 = arith.mulf %152, %151 : vector<4x128xf32>
    %cst_73 = arith.constant 0.707106769 : f32
    %154 = vector.broadcast %cst_73 : f32 to vector<4x128xf32>
    %155 = arith.mulf %151, %154 : vector<4x128xf32>
    %156 = math.absf %155 : vector<4x128xf32>
    %cst_74 = arith.constant 0.327591091 : f32
    %157 = vector.broadcast %cst_74 : f32 to vector<4x128xf32>
    %158 = arith.mulf %157, %156 : vector<4x128xf32>
    %cst_75 = arith.constant 1.000000e+00 : f32
    %159 = vector.broadcast %cst_75 : f32 to vector<4x128xf32>
    %160 = arith.addf %159, %158 : vector<4x128xf32>
    %cst_76 = arith.constant 1.000000e+00 : f32
    %161 = vector.broadcast %cst_76 : f32 to vector<4x128xf32>
    %162 = arith.divf %161, %160 : vector<4x128xf32>
    %cst_77 = arith.constant 1.06140542 : f32
    %163 = vector.broadcast %cst_77 : f32 to vector<4x128xf32>
    %164 = arith.mulf %163, %162 : vector<4x128xf32>
    %cst_78 = arith.constant -1.45315206 : f32
    %165 = vector.broadcast %cst_78 : f32 to vector<4x128xf32>
    %166 = arith.addf %164, %165 : vector<4x128xf32>
    %167 = arith.mulf %166, %162 : vector<4x128xf32>
    %cst_79 = arith.constant 1.42141378 : f32
    %168 = vector.broadcast %cst_79 : f32 to vector<4x128xf32>
    %169 = arith.addf %167, %168 : vector<4x128xf32>
    %170 = arith.mulf %169, %162 : vector<4x128xf32>
    %cst_80 = arith.constant -0.284496725 : f32
    %171 = vector.broadcast %cst_80 : f32 to vector<4x128xf32>
    %172 = arith.addf %170, %171 : vector<4x128xf32>
    %173 = arith.mulf %172, %162 : vector<4x128xf32>
    %cst_81 = arith.constant 0.254829586 : f32
    %174 = vector.broadcast %cst_81 : f32 to vector<4x128xf32>
    %175 = arith.addf %173, %174 : vector<4x128xf32>
    %176 = arith.mulf %175, %162 : vector<4x128xf32>
    %cst_82 = arith.constant 0.000000e+00 : f32
    %177 = vector.broadcast %cst_82 : f32 to vector<4x128xf32>
    %178 = arith.subf %177, %156 : vector<4x128xf32>
    %179 = arith.mulf %178, %156 : vector<4x128xf32>
    %180 = math.exp %179 : vector<4x128xf32>
    %181 = arith.mulf %176, %180 : vector<4x128xf32>
    %cst_83 = arith.constant 1.000000e+00 : f32
    %182 = vector.broadcast %cst_83 : f32 to vector<4x128xf32>
    %183 = arith.subf %182, %181 : vector<4x128xf32>
    %cst_84 = arith.constant 0.000000e+00 : f32
    %184 = vector.broadcast %cst_84 : f32 to vector<4x128xf32>
    %185 = arith.cmpf oge, %155, %184 : vector<4x128xf32>
    %cst_85 = arith.constant 0.000000e+00 : f32
    %186 = vector.broadcast %cst_85 : f32 to vector<4x128xf32>
    %187 = arith.subf %186, %183 : vector<4x128xf32>
    %188 = arith.select %185, %183, %187 : vector<4x128xi1>, vector<4x128xf32>
    %cst_86 = arith.constant 1.000000e+00 : f32
    %189 = vector.broadcast %cst_86 : f32 to vector<4x128xf32>
    %190 = arith.addf %189, %188 : vector<4x128xf32>
    %191 = arith.mulf %153, %190 : vector<4x128xf32>
    %192 = arith.mulf %150, %191 : vector<4x128xf32>
    %c0_87 = arith.constant 0 : index
    %c0_88 = arith.constant 0 : index
    %193 = vector.load %arg23[%c0_87, %c0_88] : memref<128x16xf32, #tpu.memory_space<vmem>>, vector<128x16xf32>
    %cst_89 = arith.constant dense<0.000000e+00> : vector<4x16xf32>
    %194 = tpu.matmul %192, %193, %cst_89 {dimension_numbers = #tpu.dot_dimension_numbers<[1], [0], [0], [1], [0, 0, 1, 1], [], []>} : vector<4x128xf32>, vector<128x16xf32>, vector<4x16xf32> -> vector<4x16xf32>
    %c0_90 = arith.constant 0 : index
    %c0_91 = arith.constant 0 : index
    %195 = vector.load %arg24[%c0_90, %c0_91] : memref<1x16xf32, #tpu.memory_space<vmem>>, vector<1x16xf32>
    %196 = vector.broadcast %195 : vector<1x16xf32> to vector<4x16xf32>
    %197 = arith.addf %194, %196 : vector<4x16xf32>
    %198 = arith.addf %197, %4 : vector<4x16xf32>
    %c0_92 = arith.constant 0 : index
    %c0_93 = arith.constant 0 : index
    %c0_94 = arith.constant 0 : index
    %199 = vector.load %arg25[%c0_92, %c0_93, %c0_94] : memref<1x4x16xf32, #tpu.memory_space<vmem>>, vector<1x4x16xf32>
    %200 = vector.shape_cast %199 : vector<1x4x16xf32> to vector<4x16xf32>
    %201 = vector.shape_cast %198 : vector<4x16xf32> to vector<1x4x16xf32>
    tpu.vector_store %arg25[%c0_92, %c0_93, %c0_94], %201 {strides = array<i32>} : memref<1x4x16xf32, #tpu.memory_space<vmem>>, vector<1x4x16xf32>,
    %c0_95 = arith.constant 0 : index
    %c0_96 = arith.constant 0 : index
    %202 = vector.load %arg26[%c0_95, %c0_96] : memref<4x32xf32, #tpu.memory_space<vmem>>, vector<4x32xf32>
    tpu.vector_store %arg26[%c0_95, %c0_96], %124 {strides = array<i32>} : memref<4x32xf32, #tpu.memory_space<vmem>>, vector<4x32xf32>,
    %c0_97 = arith.constant 0 : index
    %c0_98 = arith.constant 0 : index
    %203 = vector.load %arg27[%c0_97, %c0_98] : memref<4x32xf32, #tpu.memory_space<vmem>>, vector<4x32xf32>
    tpu.vector_store %arg27[%c0_97, %c0_98], %115 {strides = array<i32>} : memref<4x32xf32, #tpu.memory_space<vmem>>, vector<4x32xf32>,
    %c0_99 = arith.constant 0 : index
    %c0_100 = arith.constant 0 : index
    %204 = vector.load %arg28[%c0_99, %c0_100] : memref<4x32xf32, #tpu.memory_space<vmem>>, vector<4x32xf32>
    tpu.vector_store %arg28[%c0_99, %c0_100], %117 {strides = array<i32>} : memref<4x32xf32, #tpu.memory_space<vmem>>, vector<4x32xf32>,
    %c0_101 = arith.constant 0 : index
    %c0_102 = arith.constant 0 : index
    %205 = vector.load %arg29[%c0_101, %c0_102] : memref<4x32xf32, #tpu.memory_space<vmem>>, vector<4x32xf32>
    tpu.vector_store %arg29[%c0_101, %c0_102], %107 {strides = array<i32>} : memref<4x32xf32, #tpu.memory_space<vmem>>, vector<4x32xf32>,
    return
  }
  func.func @transform_0(%arg0: i32, %arg1: i32) -> (i32, i32, i32) {
    %c0_i32 = arith.constant 0 : i32
    %c0_i32_0 = arith.constant 0 : i32
    return %arg1, %arg0, %c0_i32 : i32, i32, i32
  }
  func.func @transform_1(%arg0: i32, %arg1: i32) -> (i32, i32) {
    %c0_i32 = arith.constant 0 : i32
    %c0_i32_0 = arith.constant 0 : i32
    return %arg0, %c0_i32 : i32, i32
  }
  func.func @transform_2(%arg0: i32, %arg1: i32) -> (i32, i32) {
    %c0_i32 = arith.constant 0 : i32
    %c0_i32_0 = arith.constant 0 : i32
    return %arg0, %c0_i32 : i32, i32
  }
  func.func @transform_3(%arg0: i32, %arg1: i32) -> (i32, i32) {
    %c0_i32 = arith.constant 0 : i32
    %c0_i32_0 = arith.constant 0 : i32
    return %arg0, %c0_i32 : i32, i32
  }
  func.func @transform_4(%arg0: i32, %arg1: i32) -> (i32, i32) {
    %c0_i32 = arith.constant 0 : i32
    %c0_i32_0 = arith.constant 0 : i32
    return %arg0, %c0_i32 : i32, i32
  }
  func.func @transform_5(%arg0: i32, %arg1: i32) -> (i32, i32) {
    %c0_i32 = arith.constant 0 : i32
    %c0_i32_0 = arith.constant 0 : i32
    %c0_i32_1 = arith.constant 0 : i32
    return %c0_i32, %c0_i32_0 : i32, i32
  }
  func.func @transform_6(%arg0: i32, %arg1: i32) -> (i32, i32) {
    %c0_i32 = arith.constant 0 : i32
    %c0_i32_0 = arith.constant 0 : i32
    %c0_i32_1 = arith.constant 0 : i32
    return %c0_i32, %c0_i32_0 : i32, i32
  }
  func.func @transform_7(%arg0: i32, %arg1: i32) -> (i32, i32) {
    %c0_i32 = arith.constant 0 : i32
    %c0_i32_0 = arith.constant 0 : i32
    %c0_i32_1 = arith.constant 0 : i32
    return %c0_i32, %c0_i32_0 : i32, i32
  }
  func.func @transform_8(%arg0: i32, %arg1: i32) -> (i32, i32) {
    %c0_i32 = arith.constant 0 : i32
    %c0_i32_0 = arith.constant 0 : i32
    %c0_i32_1 = arith.constant 0 : i32
    return %c0_i32, %c0_i32_0 : i32, i32
  }
  func.func @transform_9(%arg0: i32, %arg1: i32) -> (i32, i32) {
    %c0_i32 = arith.constant 0 : i32
    %c0_i32_0 = arith.constant 0 : i32
    %c0_i32_1 = arith.constant 0 : i32
    return %c0_i32, %c0_i32_0 : i32, i32
  }
  func.func @transform_10(%arg0: i32, %arg1: i32) -> (i32, i32) {
    %c0_i32 = arith.constant 0 : i32
    %c0_i32_0 = arith.constant 0 : i32
    %c0_i32_1 = arith.constant 0 : i32
    return %c0_i32, %c0_i32_0 : i32, i32
  }
  func.func @transform_11(%arg0: i32, %arg1: i32) -> (i32, i32) {
    %c0_i32 = arith.constant 0 : i32
    %c0_i32_0 = arith.constant 0 : i32
    %c0_i32_1 = arith.constant 0 : i32
    return %c0_i32, %c0_i32_0 : i32, i32
  }
  func.func @transform_12(%arg0: i32, %arg1: i32) -> (i32, i32) {
    %c0_i32 = arith.constant 0 : i32
    %c0_i32_0 = arith.constant 0 : i32
    %c0_i32_1 = arith.constant 0 : i32
    return %c0_i32, %c0_i32_0 : i32, i32
  }
  func.func @transform_13(%arg0: i32, %arg1: i32) -> (i32, i32) {
    %c0_i32 = arith.constant 0 : i32
    %c0_i32_0 = arith.constant 0 : i32
    %c0_i32_1 = arith.constant 0 : i32
    return %c0_i32, %c0_i32_0 : i32, i32
  }
  func.func @transform_14(%arg0: i32, %arg1: i32) -> (i32, i32) {
    %c0_i32 = arith.constant 0 : i32
    %c0_i32_0 = arith.constant 0 : i32
    %c0_i32_1 = arith.constant 0 : i32
    return %c0_i32, %c0_i32_0 : i32, i32
  }
  func.func @transform_15(%arg0: i32, %arg1: i32) -> (i32, i32) {
    %c0_i32 = arith.constant 0 : i32
    %c0_i32_0 = arith.constant 0 : i32
    %c0_i32_1 = arith.constant 0 : i32
    return %c0_i32, %c0_i32_0 : i32, i32
  }
  func.func @transform_16(%arg0: i32, %arg1: i32) -> (i32, i32) {
    %c0_i32 = arith.constant 0 : i32
    %c0_i32_0 = arith.constant 0 : i32
    %c0_i32_1 = arith.constant 0 : i32
    return %c0_i32, %c0_i32_0 : i32, i32
  }
  func.func @transform_17(%arg0: i32, %arg1: i32) -> (i32, i32) {
    %c0_i32 = arith.constant 0 : i32
    %c0_i32_0 = arith.constant 0 : i32
    %c0_i32_1 = arith.constant 0 : i32
    return %c0_i32, %c0_i32_0 : i32, i32
  }
  func.func @transform_18(%arg0: i32, %arg1: i32) -> (i32, i32) {
    %c0_i32 = arith.constant 0 : i32
    %c0_i32_0 = arith.constant 0 : i32
    %c0_i32_1 = arith.constant 0 : i32
    return %c0_i32, %c0_i32_0 : i32, i32
  }
  func.func @transform_19(%arg0: i32, %arg1: i32) -> (i32, i32) {
    %c0_i32 = arith.constant 0 : i32
    %c0_i32_0 = arith.constant 0 : i32
    %c0_i32_1 = arith.constant 0 : i32
    return %c0_i32, %c0_i32_0 : i32, i32
  }
  func.func @transform_20(%arg0: i32, %arg1: i32) -> (i32, i32) {
    %c0_i32 = arith.constant 0 : i32
    %c0_i32_0 = arith.constant 0 : i32
    %c0_i32_1 = arith.constant 0 : i32
    return %c0_i32, %c0_i32_0 : i32, i32
  }
  func.func @transform_21(%arg0: i32, %arg1: i32) -> (i32, i32) {
    %c0_i32 = arith.constant 0 : i32
    %c0_i32_0 = arith.constant 0 : i32
    %c0_i32_1 = arith.constant 0 : i32
    return %c0_i32, %c0_i32_0 : i32, i32
  }
  func.func @transform_22(%arg0: i32, %arg1: i32) -> (i32, i32) {
    %c0_i32 = arith.constant 0 : i32
    %c0_i32_0 = arith.constant 0 : i32
    %c0_i32_1 = arith.constant 0 : i32
    return %c0_i32, %c0_i32_0 : i32, i32
  }
  func.func @transform_23(%arg0: i32, %arg1: i32) -> (i32, i32, i32) {
    %c0_i32 = arith.constant 0 : i32
    %c0_i32_0 = arith.constant 0 : i32
    return %arg1, %arg0, %c0_i32 : i32, i32, i32
  }
  func.func @transform_24(%arg0: i32, %arg1: i32) -> (i32, i32) {
    %c0_i32 = arith.constant 0 : i32
    %c0_i32_0 = arith.constant 0 : i32
    return %arg0, %c0_i32 : i32, i32
  }
  func.func @transform_25(%arg0: i32, %arg1: i32) -> (i32, i32) {
    %c0_i32 = arith.constant 0 : i32
    %c0_i32_0 = arith.constant 0 : i32
    return %arg0, %c0_i32 : i32, i32
  }
  func.func @transform_26(%arg0: i32, %arg1: i32) -> (i32, i32) {
    %c0_i32 = arith.constant 0 : i32
    %c0_i32_0 = arith.constant 0 : i32
    return %arg0, %c0_i32 : i32, i32
  }
  func.func @transform_27(%arg0: i32, %arg1: i32) -> (i32, i32) {
    %c0_i32 = arith.constant 0 : i32
    %c0_i32_0 = arith.constant 0 : i32
    return %arg0, %c0_i32 : i32, i32
  }
}

</mosaic_0001>

<bundles_post_ra>
// kernel: tpu_custom_call.1
= control target key start
LH: loop header
LB: loop body
LE: loop exit
PB: predicated region body
PF: predicated region fallthrough
CT: control target
= control target key end

     0   :  { %s3869_s0 = inlined_call_operand.vmem [shape: f32[6,4,16], index: 0, kind: input, shape index: {}]   ;;  %s3870_s1 = inlined_call_operand.hbm [shape: f32[4,32], index: 1, kind: input, shape index: {}, may-alias: {1,24}]   ;;  %s3871_s2 = inlined_call_operand.hbm [shape: f32[4,32], index: 2, kind: input, shape index: {}, may-alias: {2,25}]   ;;  %s3872_s3 = inlined_call_operand.hbm [shape: f32[4,32], index: 3, kind: input, shape index: {}, may-alias: {3,26}]   ;;  %s3873_s4 = inlined_call_operand.hbm [shape: f32[4,32], index: 4, kind: input, shape index: {}, may-alias: {4,27}]   ;;  %s3874_s5 = inlined_call_operand.vmem [shape: f32[1,16], index: 5, kind: input, shape index: {}]   ;;  %s3875_s6 = inlined_call_operand.vmem [shape: f32[1,16], index: 6, kind: input, shape index: {}]   ;;  %s3876_s7 = inlined_call_operand.vmem [shape: f32[1,4], index: 7, kind: input, shape index: {}]   ;;  %s3877_s8 = inlined_call_operand.<no memory space> [shape: f32[1,1], index: 8, kind: input, shape index: {}]   ;;  %s3878_s9 = inlined_call_operand.vmem [shape: f32[16,64], index: 9, kind: input, shape index: {}]   ;;  %s3879_s10 = inlined_call_operand.vmem [shape: f32[1,64], index: 10, kind: input, shape index: {}]   ;;  %s3880_s11 = inlined_call_operand.vmem [shape: f32[16,64], index: 11, kind: input, shape index: {}]   ;;  %s3881_s12 = inlined_call_operand.vmem [shape: f32[1,64], index: 12, kind: input, shape index: {}]   ;;  %s3882_s13 = inlined_call_operand.vmem [shape: f32[32,128], index: 13, kind: input, shape index: {}]   ;;  %s3883_s14 = inlined_call_operand.vmem [shape: f32[1,128], index: 14, kind: input, shape index: {}]   ;;  %s3884_s15 = inlined_call_operand.vmem [shape: f32[32,128], index: 15, kind: input, shape index: {}]   ;;  %s3885_s16 = inlined_call_operand.vmem [shape: f32[128,32], index: 16, kind: input, shape index: {}]   ;;  %s3886_s17 = inlined_call_operand.vmem [shape: f32[1,32], index: 17, kind: input, shape index: {}]   ;;  %s3887_s18 = inlined_call_operand.vmem [shape: f32[1,32], index: 18, kind: input, shape index: {}]   ;;  %s3888_s19 = inlined_call_operand.vmem [shape: f32[32,256], index: 19, kind: input, shape index: {}]   ;;  %s3889_s20 = inlined_call_operand.vmem [shape: f32[1,256], index: 20, kind: input, shape index: {}]   ;;  %s3890_s21 = inlined_call_operand.vmem [shape: f32[128,16], index: 21, kind: input, shape index: {}]   ;;  %s3891_s22 = inlined_call_operand.vmem [shape: f32[1,16], index: 22, kind: input, shape index: {}]   ;;  %s3892_s23 = inlined_call_operand.hbm [shape: f32[6,4,16], index: 23, kind: output, shape index: {0}]   ;;  %s3893_s24 = inlined_call_operand.hbm [shape: f32[4,32], index: 24, kind: output, shape index: {1}, may-alias: {1,24}]   ;;  %s3894_s25 = inlined_call_operand.hbm [shape: f32[4,32], index: 25, kind: output, shape index: {2}, may-alias: {2,25}]   ;;  %s3895_s26 = inlined_call_operand.hbm [shape: f32[4,32], index: 26, kind: output, shape index: {3}, may-alias: {3,26}]   ;;  %s3896_s27 = inlined_call_operand.hbm [shape: f32[4,32], index: 27, kind: output, shape index: {4}, may-alias: {4,27}]  }
   0x1   :  { %3931 = sst [smem:[#allocation36_spill]] %s3869_s0 }
   0x2   :  { %3932 = sst [smem:[#allocation37_spill]] %s3870_s1 }
   0x3   :  { %3933 = sst [smem:[#allocation38_spill]] %s3871_s2 }
   0x4   :  { %3934 = sst [smem:[#allocation39_spill]] %s3872_s3 }
   0x5   :  { %3935 = sst [smem:[#allocation40_spill]] %s3873_s4 }
   0x6   :  { %3936 = sst [smem:[#allocation41_spill]] %s3874_s5 }
   0x7   :  { %3937 = sst [smem:[#allocation42_spill]] %s3875_s6 }
   0x8   :  { %3938 = sst [smem:[#allocation43_spill]] %s3876_s7 }
   0x9   :  { %3939 = sst [smem:[#allocation44_spill]] %s3877_s8 }
   0xa   :  { %3940 = sst [smem:[#allocation45_spill]] %s3878_s9  ;;  %s3951_s8 = sld [smem:[#allocation44_spill]] }
   0xb   :  { %3941 = sst [smem:[#allocation46_spill]] %s3879_s10 }
   0xc   :  { %3942 = sst [smem:[#allocation47_spill]] %s3880_s11 }
   0xd   :  { %3943 = sst [smem:[#allocation48_spill]] %s3889_s20 }
   0xe   :  { %3944 = sst [smem:[#allocation49_spill]] %s3890_s21 }
   0xf   :  { %3945 = sst [smem:[#allocation50_spill]] %s3891_s22 }
  0x10   :  { %3946 = sst [smem:[#allocation51_spill]] %s3892_s23 }
  0x11   :  { %3947 = sst [smem:[#allocation52_spill]] %s3893_s24 }
  0x12   :  { %3948 = sst [smem:[#allocation53_spill]] %s3894_s25 }
  0x13   :  { %3949 = sst [smem:[#allocation54_spill]] %s3895_s26 }
  0x14   :  { %3950 = sst [smem:[#allocation55_spill]] %s3896_s27 }
  0x15   :  { %33 = sst [smem:[#allocation2]] %s3951_s8 }
  0x16   :  { %34 = vsyncpa [#allocation4], 0 }
  0x17   :  { %35 = vsyncpa [#allocation8], 0 }
  0x18   :  { %36 = vsyncpa [#allocation11], 0 }
  0x19   :  { %37 = vsyncpa [#allocation6], 0 }
  0x1a   :  { %38 = vsyncpa [#allocation5], 0 }
  0x1b   :  { %40 = vsyncpa [#allocation5 + $0x1], 0 }
  0x1c   :  { %41 = vsyncpa [#allocation15], 0 }
  0x1d   :  { %42 = vsyncpa [#allocation18], 0  ;;  %s3224_s30 = smov 0   ;;  %s3226_s9 = smov 0  }
  0x1e   :  { %s3228_s5 = smov 0   ;;  %s3230_s28 = smov 0  }
  0x1f   :  { %s3232_s0 = smov 0   ;;  %s3234_s10 = smov 0  }
  0x20 LB: > { %3952 = sst [smem:[#allocation27_spill]] %s3039_s30  ;;  %s2181_s29 = sadd.s32 4294967295, %s3059_s10   ;;  %s3059_s10 = sphi %s3234_s10, %s48_s10   ;;  %s3055_s0 = sphi %s3232_s0, %s4006_s0   ;;  %s3051_s28 = sphi %s3230_s28, %s4005_s28   ;;  %s3047_s5 = sphi %s3228_s5, %s4004_s5   ;;  %s3043_s9 = sphi %s3226_s9, %s4008_s9   ;;  %s3039_s30 = sphi %s3224_s30, %s4007_s30  }
  0x21   : > { %3953 = sst [smem:[#allocation28_spill]] %s3047_s5  ;;  %s2182_s1 = sadd.s32 4294967294, %s3059_s10  }
  0x22   : > { %3954 = sst [smem:[#allocation29_spill]] %s3055_s0  ;;  %s57_s6 = sadd.s32 1, %s3055_s0 }
  0x23   : > { %3955 = sst [smem:[#allocation30_spill]] %s3059_s10  ;;  %s579_s11 = sadd.s32 1, %s3047_s5 }
  0x24   : > { %p58_p0 = scmp.ge.s32.totalorder %s57_s6, 6  ;;  %p589_p1 = scmp.ne.s32.totalorder %s3047_s5, %s3043_s9 }
  0x25   : > { %p3260_p2 = scmp.eq.s32.totalorder %s2181_s29, 5  ;;  %p595_p3 = scmp.ne.s32.totalorder %s3043_s9, %s3039_s30 }
  0x26   : > { %s4010_s6 = smov (%p58_p0, %s57_s6), 0  ;;  %p596_p5 = scmp.eq.s32.totalorder %s2182_s1, 5 }
  0x27   : > { %s3956_s2 = scalar_select %p3260_p2, 1, 0 }
  0x28   : > { %3958 = sst [smem:[#allocation32_spill]] %s4010_s6  ;;  %p3270_p4 = por %p3260_p2, %p589_p1 }
  0x29   : > { %3957 = sst [smem:[#allocation31_spill]] %s3956_s2  ;;  %s574_s7 = ssub.s32 %s3055_s0, %s4010_s6 }
  0x2a   : > { %s3959_s3 = scalar_select %p3270_p4, 1, 0 }
  0x2b   : > { %p2183_p6 = scmp.ge.s32.totalorder %s3059_s10, 1  ;;  %p577_p7 = scmp.eq.s32.totalorder %s574_s7, 0 }
  0x2c   : > { %3960 = sst [smem:[#allocation33_spill]] %s3959_s3  ;;  %p3277_p8 = por %p596_p5, %p595_p3 }
  0x2d   : > { %p707_p9 = scmp.lt.s32.totalorder %s3059_s10, 7  ;;  %p3289_p11 = scmp.eq.s32.totalorder %s2181_s29, 0 }
  0x2e   : > { %s3961_s4 = scalar_select %p3277_p8, 1, 0 }
  0x2f   : > { %s3283_s8 = scalar_select %p577_p7, %s3047_s5, %s579_s11  }
  0x30   : > { %3962 = sst [smem:[#allocation34_spill]] %s3961_s4  ;;  %p3285_p10 = pnand %p2183_p6, %p707_p9 }
  0x31   : > { %3963 = sst [smem:[#allocation35_spill]] %s3283_s8  ;;  %s3061_s1 = smov [#allocation7]  }
  0x32   : > { %s3964_s30 = scalar_select %p3285_p10, 1, 0 }
  0x33   : > { %s3965_s23 = scalar_select %p3289_p11, 1, 0 }
  0x34   : > { %p2596_p12 = pneg %p3285_p10  ;;  %s735_s7 = sshll.u32 %s3061_s1, 4  ;;  %s736_s7 = int_to_ptr.vmem [resolvable:$true] %s735_s7 }
  0x35   : > { %s3062_s11 = smov [#allocation3]   ;;  %s3967_s5 = sld [smem:[#allocation38_spill]] }
  0x36   : > { %p3297_p13 = pnand %p3289_p11, %p2596_p12  ;;  %s722_s0 = sshll.u32 %s3062_s11, 4  ;;  %s3301_s0 = int_to_ptr.vmem [resolvable:$true] %s722_s0 }
  0x38   : > { %p3311_p1 = pneg %p3297_p13 }
  0x3b   : > { %s3968_s4 = smov %s3967_s5  ;;  %s2726_s10 = scalar_lea.hbm %s3967_s5, 64 }
  0x3c   : > { %p2727_p0 = scmp.ne.s32.totalorder %s3968_s4, %s2726_s10  ;;  %p2733_p6 = scmp.lt.u32.totalorder %s2726_s10, %s3968_s4 }
  0x3e   : > { %p2729_p3 = pnand %p3311_p1, %p2727_p0 }
  0x40   : > { %p2730_p5 = pneg %p2729_p3 }
  0x42   : > { %p2735_p7 = pnand %p2733_p6, %p2730_p5 }
  0x44   : > { %2738 = shalt.err (!%p2735_p7)
}
  0x45   : > { %s2739_s5 = scalar_lea.vmem %s736_s7, 64  ;;  %p2747_p4 = scmp.lt.s32.totalorder %s736_s7, %s736_s7 }
  0x46   : > { %p2740_p9 = scmp.ne.s32.totalorder %s736_s7, %s2739_s5  ;;  %p2748_p2 = scmp.lt.s32.totalorder %s2739_s5, %s2739_s5 }
  0x48   : > { %p2742_p12 = pnand %p2740_p9, %p3311_p1  ;;  %p2749_p11 = por %p2748_p2, %p2747_p4 }
  0x4a   : > { %p2743_p8 = pneg %p2742_p12 }
  0x4c   : > { %p2750_p10 = pnand %p2749_p11, %p2743_p8 }
  0x4e   : > { %2753 = shalt.err (!%p2750_p10)
}
  0x4f   : > { %2602 = dma.hbm_to_vmem [thread:$0]  (!%p3297_p13), %s3968_s4, 64, %s736_s7, [#allocation8]  }
  0x50   : > { %s3970_s8 = sld [smem:[#allocation37_spill]] }
  0x56   : > { %s2754_s29 = scalar_lea.hbm %s3970_s8, 64 }
  0x57   : > { %p2755_p0 = scmp.ne.s32.totalorder %s3970_s8, %s2754_s29  ;;  %p2761_p4 = scmp.lt.u32.totalorder %s2754_s29, %s3970_s8 }
  0x59   : > { %p2757_p3 = pnand %p2755_p0, %p3311_p1 }
  0x5b   : > { %p2758_p2 = pneg %p2757_p3 }
  0x5d   : > { %p2763_p8 = pnand %p2761_p4, %p2758_p2 }
  0x5f   : > { %2766 = shalt.err (!%p2763_p8)
}
  0x60   : > { %s2767_s7 = scalar_lea.vmem %s3301_s0, 64  ;;  %p2775_p6 = scmp.lt.s32.totalorder %s3301_s0, %s3301_s0 }
  0x61   : > { %p2768_p10 = scmp.ne.s32.totalorder %s3301_s0, %s2767_s7  ;;  %p2776_p7 = scmp.lt.s32.totalorder %s2767_s7, %s2767_s7 }
  0x63   : > { %p2770_p11 = pnand %p2768_p10, %p3311_p1  ;;  %p2777_p9 = por %p2776_p7, %p2775_p6 }
  0x65   : > { %p2771_p5 = pneg %p2770_p11 }
  0x67   : > { %p2778_p12 = pnand %p2777_p9, %p2771_p5 }
  0x69   : > { %2781 = shalt.err (!%p2778_p12)
}
  0x6a   : > { %2599 = dma.hbm_to_vmem [thread:$0]  (!%p3297_p13), %s3970_s8, 64, %s3301_s0, [#allocation4]  }
  0x6b   : > { %s3063_s22 = smov [#allocation9]   ;;  %s3064_s27 = smov [#allocation10]  }
  0x6c   : > { %s748_s3 = sshll.u32 %s3063_s22, 4  ;;  %s761_s10 = sshll.u32 %s3064_s27, 4  ;;  %s749_s3 = int_to_ptr.vmem [resolvable:$true] %s748_s3  ;;  %s762_s10 = int_to_ptr.vmem [resolvable:$true] %s761_s10 }
  0x6d   : > { %s3971_s5 = sld [smem:[#allocation39_spill]] }
  0x73   : > { %s3972_s4 = smov %s3971_s5  ;;  %s2782_s7 = scalar_lea.hbm %s3971_s5, 64 }
  0x74   : > { %p2783_p0 = scmp.ne.s32.totalorder %s3972_s4, %s2782_s7  ;;  %p2789_p4 = scmp.lt.u32.totalorder %s2782_s7, %s3972_s4 }
  0x76   : > { %p2785_p3 = pnand %p2783_p0, %p3311_p1 }
  0x78   : > { %p2786_p2 = pneg %p2785_p3 }
  0x7a   : > { %p2791_p8 = pnand %p2789_p4, %p2786_p2 }
  0x7c   : > { %2794 = shalt.err (!%p2791_p8)
}
  0x7d   : > { %s2795_s0 = scalar_lea.vmem %s749_s3, 64  ;;  %p2803_p6 = scmp.lt.s32.totalorder %s749_s3, %s749_s3 }
  0x7e   : > { %p2796_p10 = scmp.ne.s32.totalorder %s749_s3, %s2795_s0  ;;  %p2804_p7 = scmp.lt.s32.totalorder %s2795_s0, %s2795_s0 }
  0x80   : > { %p2798_p11 = pnand %p2796_p10, %p3311_p1  ;;  %p2805_p9 = por %p2804_p7, %p2803_p6 }
  0x82   : > { %p2799_p5 = pneg %p2798_p11 }
  0x84   : > { %p2806_p12 = pnand %p2805_p9, %p2799_p5 }
  0x86   : > { %2809 = shalt.err (!%p2806_p12)
}
  0x87   : > { %2605 = dma.hbm_to_vmem [thread:$0]  (!%p3297_p13), %s3972_s4, 64, %s749_s3, [#allocation8]  }
  0x88   : > { %s3973_s22 = sld [smem:[#allocation43_spill]]  ;;  %s3974_s5 = sld [smem:[#allocation40_spill]] }
  0x8e   : > { %s778_s27 = sshll.u32 %s3973_s22, 4  ;;  %s3975_s7 = smov %s3974_s5  ;;  %s779_s27 = int_to_ptr.vmem [resolvable:$true] %s778_s27 }
  0x8f   : > { %s2810_s25 = scalar_lea.hbm %s3974_s5, 64 }
  0x90   : > { %p2811_p0 = scmp.ne.s32.totalorder %s3975_s7, %s2810_s25  ;;  %p2817_p4 = scmp.lt.u32.totalorder %s2810_s25, %s3975_s7 }
  0x92   : > { %p2813_p3 = pnand %p2811_p0, %p3311_p1 }
  0x94   : > { %p2814_p2 = pneg %p2813_p3 }
  0x96   : > { %p2819_p8 = pnand %p2817_p4, %p2814_p2 }
  0x98   : > { %2822 = shalt.err (!%p2819_p8)
}
  0x99   : > { %s2823_s3 = scalar_lea.vmem %s762_s10, 64  ;;  %p2831_p6 = scmp.lt.s32.totalorder %s762_s10, %s762_s10 }
  0x9a   : > { %p2824_p10 = scmp.ne.s32.totalorder %s762_s10, %s2823_s3  ;;  %p2832_p7 = scmp.lt.s32.totalorder %s2823_s3, %s2823_s3 }
  0x9c   : > { %p2826_p11 = pnand %p2824_p10, %p3311_p1  ;;  %p2833_p9 = por %p2832_p7, %p2831_p6 }
  0x9e   : > { %p2827_p5 = pneg %p2826_p11 }
  0xa0   : > { %p2834_p12 = pnand %p2833_p9, %p2827_p5 }
  0xa2   : > { %2837 = shalt.err (!%p2834_p12)
}
  0xa3   : > { %2608 = dma.hbm_to_vmem [thread:$0]  (!%p3297_p13), %s3975_s7, 64, %s762_s10, [#allocation11]  }
  0xa4   : > { %s2838_s21 = scalar_lea.vmem %s779_s27, 16  ;;  %p2846_p4 = scmp.lt.s32.totalorder %s779_s27, %s779_s27 }
  0xa5   : > { %p2839_p0 = scmp.ne.s32.totalorder %s779_s27, %s2838_s21  ;;  %p2847_p8 = scmp.lt.s32.totalorder %s2838_s21, %s2838_s21 }
  0xa7   : > { %p2841_p3 = pnand %p2839_p0, %p3311_p1  ;;  %p2848_p10 = por %p2847_p8, %p2846_p4 }
  0xa9   : > { %p2842_p2 = pneg %p2841_p3 }
  0xab   : > { %p2849_p11 = pnand %p2848_p10, %p2842_p2 }
  0xad   : > { %2852 = shalt.err (!%p2849_p11)
}
  0xae   : > { %s3065_s20 = smov [#allocation12]   ;;  %p3976_p5 = scmp.ne.s32.totalorder %s3964_s30, 0 }
  0xaf   : > { %2611 = dma.vmem_to_smem (!%p3297_p13), %s779_s27, 16, %s3065_s20, [#allocation6]  }
  0xb0   : > { %846 = sbr.rel (%p3976_p5) target bundleno = 3448 (0xd78), region = 112  ;;  %p3977_p6 = scmp.ne.s32.totalorder (!%p3976_p5), %s3965_s23, 0 }
  0xb7   : > { %3010 = dma.done.wait (%p3977_p6), [#allocation4], 64  }
  0xb8   : > { %3012 = vsyncadd (%p3977_p6), [#allocation4], 4294967232 }
  0xb9   : > { %3014 = dma.done.wait (%p3977_p6), [#allocation8], 128  }
  0xba   : > { %3016 = vsyncadd (%p3977_p6), [#allocation8], 4294967168 }
  0xbb   : > { %3018 = dma.done.wait (%p3977_p6), [#allocation11], 64  }
  0xbc   : > { %3020 = vsyncadd (%p3977_p6), [#allocation11], 4294967232 }
  0xbd   : > { %3022 = dma.done.wait (%p3977_p6), [#allocation6], 16  }
  0xbe   : > { %3024 = vsyncadd (%p3977_p6), [#allocation6], 4294967280 }
  0xbf   : > { %868 = sfence }
  0xc0   : > { %s3928_s30 = sand.u32 1, %s3043_s9   ;;  %p937_p13 = scmp.lt.s32.totalorder %s3051_s28, 5 }
  0xc1   : > { %s3415_s6 = sshll.u32 %s3928_s30, 2  ;;  %s3978_s27 = sld [smem:[#allocation36_spill]] }
  0xc2   : > { %s938_s1 = scalar_select %p937_p13, %s3051_s28, 5 }
  0xc3   : > { %p2198_p1 = scmp.ne.s32.totalorder %s3051_s28, 0 }
  0xc4   : > { %s2197_s10 = sshll.u32 %s938_s1, 2  ;;  %v948_v0 = vld [vmem:[#allocation3] sm:$0xf] (!%p2198_p1)  ;;  %vm949_vm0 = vcmask (!%p2198_p1), 257024   ;;  %v951_v1 = vld [vmem:[#allocation7] sm:$0xf] (!%p2198_p1) }
  0xc5   : > { %947 = sbr.rel (%p2198_p1) target bundleno = 204 (0xcc), region = 136  ;;  %950 = vst.msk [vmem:[#allocation14] sm:$0xf] (!%p2198_p1), %vm949_vm0, %v948_v0  ;;  %952 = vst.msk [vmem:[#allocation16] sm:$0xf] (!%p2198_p1), %vm949_vm0, %v951_v1 }
  0xc6   : > { %v953_v2 = vld [vmem:[#allocation9] sm:$0xf] (!%p2198_p1)  ;;  %v955_v3 = vld [vmem:[#allocation10] sm:$0xf] (!%p2198_p1) }
  0xc7   : > { %s943_s29 = scalar_lea.vmem %s3978_s27, %s2197_s10  ;;  %954 = vst.msk [vmem:[#allocation17] sm:$0xf] (!%p2198_p1), %vm949_vm0, %v953_v2  ;;  %956 = vst.msk [vmem:[#allocation19] sm:$0xf] (!%p2198_p1), %vm949_vm0, %v955_v3 }
  0xcc PF: > { %v3423_v4 = vld [vmem:[%s943_s29] sm:$0xf]  ;;  %vm962_vm1 = vcmask 125952   ;;  %v1044_v12 = vld [vmem:[%s3882_s13 + $0x8] sm:$0xff]  ;;  %v3066_v14 = vmov 0.0|0.0   ;;  %v1045_v15 = vld [vmem:[%s3882_s13 + $0x10] sm:$0xff]  ;;  %v993_v46 = vlaneseq }
  0xcd   : > { %v963_v5 = vsel %vm962_vm1, %v3423_v4, 0.0  ;;  %v1043_v11 = vld [vmem:[%s3882_s13] sm:$0xff]  ;;  %2454 = vmatprep.subr.bf16.mxu0 %v3066_v14  ;;  %2463 = vmatprep.subr.bf16.mxu1 %v3066_v14  ;;  %v1046_v16 = vld [vmem:[%s3882_s13 + $0x18] sm:$0xff]  ;;  %vm1054_vm2 = vcmask 261120   ;;  %s3979_s1 = sld [smem:[#allocation45_spill]]  ;;  %vm3067_vm3 = vmmov 0  }
  0xce   : > { %964 = vadd.xlane.f32.xlu0 %v963_v5  ;;  %v2455_v13 = vpack.c.bf16 %v1044_v12, %v1043_v11  ;;  %v2458_v17 = vpack.c.bf16 %v1046_v16, %v1045_v15  ;;  %v958_v18 = vld [vmem:[#allocation14] sm:$0xf]  ;;  %v3068_v20 = vmov 0.0   ;;  %s3980_s29 = sld [smem:[#allocation41_spill]]  ;;  %s3981_s25 = sld [smem:[#allocation42_spill]]  ;;  %vm1137_vm4 = vcmask 130048  }
  0xcf   : > { %2310 = vmatprep.mubr.msk.f32.mxu0 %vm3067_vm3, %v3068_v20  ;;  %2324 = vmatprep.mubr.msk.f32.mxu1 %vm3067_vm3, %v3068_v20  ;;  %s3069_s0 = smov 16   ;;  %vm998_vm5 = vcmask 1047680   ;;  %v2205_v39 = vld [vmem:[%s3883_s14] ss:$0 sm:$0xff]  ;;  %s3070_s8 = smov 114   ;;  %v994_v47 = vand.u32 127, %v993_v46 }
  0xd0   : > { %2456 = vmatpush3.bf16.msra.mxu0 %v2455_v13  ;;  %s3071_s2 = smov 113   ;;  %s3072_s21 = smov 115   ;;  %v961_v45 = vld [vmem:[#allocation19] sm:$0xf]  ;;  %vm1919_vm9 = vcmask 257024  }
  0xd1   : > { %2457 = vmatprep.subr.bf16.mxu0 %v3066_v14  ;;  %s3073_s20 = smov 64   ;;  %s3982_s22 = sld [smem:[#allocation47_spill]]  ;;  %vm1015_vm6 = vcmp.ge.s32.totalorder %v994_v47, 2  ;;  %vm1005_vm7 = vcmp.ge.s32.totalorder %v994_v47, 1  ;;  %vm1024_vm8 = vcmp.ge.s32.totalorder %v994_v47, 3 }
  0xd2   : > { %s3074_s23 = smov 96   ;;  %s3075_s5 = smov 32  }
  0xd3   : > { %v1128_v19 = vld [vmem:[%s3979_s1] sm:$0xff]  ;;  %v1129_v21 = vld [vmem:[%s3979_s1 + $0x8] sm:$0xff]  ;;  %s2203_s24 = sld [smem:[#allocation12 + $0x1]]  ;;  %s1029_s3 = sld [smem:[#allocation12]] }
  0xd4   : > { %2459 = vmatpush3.bf16.msra.mxu0 %v2458_v17  ;;  %v2461_v22 = vpack.c.bf16 %v1129_v21, %v1128_v19  ;;  %v2199_v27 = vld [vmem:[%s3980_s29] ss:$0 sm:$0xff]  ;;  %s3983_s26 = sld [smem:[#allocation46_spill]]  ;;  %s3984_s29 = sld [smem:[#allocation49_spill]] }
  0xd5   : > { %2460 = vmatprep.subr.bf16.mxu0 %v3066_v14  ;;  %v2200_v29 = vld [vmem:[%s3981_s25] ss:$0 sm:$0xff]  ;;  %s2201_s25 = sld [smem:[#allocation12 + $0x3]] }
  0xd7   : > { %2311 = vmatmul.mubr.msk.f32.vlgmr.msra.gmra.mrb[0].mxu0 %vm1054_vm2, %v958_v18  ;;  %v1211_v42 = vld [vmem:[%s3982_s22] sm:$0xff]  ;;  %v1212_v43 = vld [vmem:[%s3982_s22 + $0x8] sm:$0xff] }
  0xd8   : > { %2317 = vmatprep.mubr.msk.f32.mxu0 %vm3067_vm3, %v3068_v20  ;;  %2462 = vmatpush3.bf16.msra.mxu0 %v2461_v22  ;;  %v2464_v44 = vpack.c.bf16 %v1212_v43, %v1211_v42  ;;  %v960_v22 = vld [vmem:[#allocation17] sm:$0xf] }
  0xd9   : > { %2466 = vmatprep.subr.bf16.mxu0 %v3066_v14  ;;  %v1021_v52 = vstv %s2203_s24  ;;  %v1030_v57 = vstv %s1029_s3 }
  0xda   : > { %2465 = vmatpush3.bf16.msra.mxu1 %v2464_v44 }
  0xdb   : > { %2472 = vmatprep.subr.bf16.mxu1 %v3066_v14  ;;  %v996_v48 = vstv %s2201_s25 }
 0x15b   : > { %v965_v6 = vpop.xlane.xlu0 %964 }
 0x15c   : > { %v967_v7 = vmul.f32 0.0625, %v965_v6 }
 0x15e   : > { %v968_v8 = vsub.f32 %v3423_v4, %v967_v7 }
 0x160   : > { %v969_v9 = vmul.f32 %v968_v8, %v968_v8 }
 0x162   : > { %v970_v10 = vsel %vm962_vm1, %v969_v9, 0.0  ;;  %v2209_v9 = vld [vmem:[%s3881_s12] ss:$0 sm:$0xff] }
 0x163   : > { %971 = vadd.xlane.f32.xlu0 %v970_v10 }
 0x1aa   : > { %v1124_v32 = vpop.f32.mrb[0].mxu0 }
 0x1ab   : > { %v2312_v33 = vpop.f32.mrb[1].mxu0  ;;  %v3473_v41 = vadd.f32 %v2205_v39, %v1124_v32 }
 0x1ac   : > { %v1357_v33 = vld [vmem:[%s3884_s15] sm:$0xff] }
 0x1f0   : > { %v972_v23 = vpop.xlane.xlu0 %971 }
 0x1f1   : > { %v973_v24 = vmul.f32 0.0625, %v972_v23  ;;  %v959_v23 = vld [vmem:[#allocation16] sm:$0xf] }
 0x1f3   : > { %v974_v25 = vadd.f32 1e-05, %v973_v24  ;;  %v2207_v24 = vld [vmem:[%s3983_s26] ss:$0 sm:$0xff]  ;;  %s3077_s26 = smov [#allocation17]  }
 0x1f5   : > { %2702 = vrsqrt.f32 %v974_v25 }
 0x1ff   : > { %v2703_v26 = vpop.eup %2702 }
 0x200   : > { %v976_v28 = vmul.f32 %v2703_v26, %v968_v8 }
 0x202   : > { %v984_v30 = vmul.f32 %v2199_v27, %v976_v28 }
 0x204   : > { %v992_v31 = vadd.f32 %v2200_v29, %v984_v30 }
 0x206   : > { %999 = vrot.lane.b32.xlu1 %v992_v31, %s3069_s0  ;;  %2318 = vmatmul.mubr.msk.f32.vlgmr.msra.gmra.mrb[2].mxu0 %vm1137_vm4, %v992_v31  ;;  %v997_v55 = vmul.f32 %v996_v48, %v992_v31 }
 0x207   : > { %2335 = vmatprep.mubr.msk.f32.mxu0 %vm3067_vm3, %v3068_v20 }
 0x278   : > { %v1000_v34 = vpop.permute.xlu1 %999 }
 0x279   : > { %v1001_v35 = vsel %vm998_vm5, %v1000_v34, %v992_v31  ;;  %v1358_v34 = vld [vmem:[%s3884_s15 + $0x8] sm:$0xff] }
 0x27a   : > { %1002 = vrot.lane.b32.xlu1 %v1001_v35, %s3069_s0  ;;  %s2202_s0 = sld [smem:[#allocation12 + $0x2]]  ;;  %v1359_v35 = vld [vmem:[%s3884_s15 + $0x10] sm:$0xff] }
 0x280   : > { %v1012_v49 = vstv %s2202_s0 }
 0x2d9   : > { %v3468_v36 = vpop.f32.mrb[2].mxu0 }
 0x2da   : > { %v2319_v37 = vpop.f32.mrb[3].mxu0  ;;  %v1208_v25 = vadd.f32 %v2207_v24, %v3468_v36  ;;  %v3514_v36 = vpack.c.bf16 %v1358_v34, %v1357_v33 }
 0x2db   : > { %v1360_v37 = vld [vmem:[%s3884_s15 + $0x18] sm:$0xff] }
 0x2dc   : > { %v1293_v28 = vadd.f32 %v1208_v25, %v3473_v41  ;;  %2468 = vmatpush3.bf16.msra.mxu0 %v3514_v36 }
 0x2dd   : > { %2469 = vmatprep.subr.bf16.mxu0 %v3066_v14 }
 0x2ec   : > { %v1003_v38 = vpop.permute.xlu1 %1002 }
 0x2ed   : > { %v1004_v40 = vsel %vm998_vm5, %v1003_v38, %v992_v31  ;;  %v3520_v38 = vpack.c.bf16 %v1360_v37, %v1359_v35 }
 0x2ee   : > { %1016 = vrot.lane.b32.xlu1 %v1004_v40, %s3070_s8  ;;  %1007 = vrot.lane.b32.xlu0 %v1004_v40, %s3071_s2  ;;  %s1033_s8 = sld [smem:[#allocation2]]  ;;  %s3985_s2 = sld [smem:[#allocation48_spill]] }
 0x2ef   : > { %2471 = vmatpush3.bf16.msra.mxu0 %v3520_v38 }
 0x2f0   : > { %2496 = vmatprep.subr.bf16.mxu0 %v3066_v14 }
 0x2f2   : > { %1025 = vrot.lane.b32.xlu1 %v1004_v40, %s3072_s21  ;;  %1296 = vrot.lane.b32.xlu0 %v3473_v41, %s3073_s20  ;;  %s3986_s21 = sld [smem:[#allocation31_spill]]  ;;  %s3076_s20 = smov [#allocation14]  }
 0x2f3   : > { %s1960_s10 = sshll.u32 %s3076_s20, 4  ;;  %s1961_s10 = int_to_ptr.vmem [resolvable:$true] %s1960_s10 }
 0x2f4   : > { %v1034_v0 = vstv %s1033_s8  ;;  %s2853_s27 = scalar_lea.vmem %s1961_s10, 64  ;;  %p2860_p3 = scmp.lt.s32.totalorder %s1961_s10, %s1961_s10 }
 0x2f5   : > { %p2854_p7 = scmp.ne.s32.totalorder %s1961_s10, %s2853_s27  ;;  %p2861_p2 = scmp.lt.s32.totalorder %s2853_s27, %s2853_s27 }
 0x2f6   : > { %1306 = vrot.lane.b32.xlu1 %v3473_v41, %s3074_s23 }
 0x2f7   : > { %p2862_p4 = por %p2861_p2, %p2860_p3 }
 0x2f8   : > { %p3987_p9 = scmp.ne.s32.totalorder %s3986_s21, 0 }
 0x2fa   : > { %1311 = vrot.lane.b32.xlu1 %v961_v45, %s3075_s5  ;;  %p2855_p12 = pnand %p2854_p7, %p3987_p9 }
 0x2fc   : > { %p2856_p0 = pneg %p2855_p12 }
 0x2fe   : > { %p2863_p8 = pnand %p2862_p4, %p2856_p0 }
 0x360   : > { %v1017_v50 = vpop.permute.xlu1 %1016  ;;  %v1008_v51 = vpop.permute.xlu0 %1007 }
 0x361   : > { %v1019_v53 = vsel %vm1015_vm6, %v1017_v50, 0.0  ;;  %v1010_v54 = vsel %vm1005_vm7, %v1008_v51, 0.0 }
 0x362   : > { %v1013_v56 = vmul.f32 %v1012_v49, %v1010_v54  ;;  %v1022_v58 = vmul.f32 %v1021_v52, %v1019_v53  ;;  %v1436_v52 = vld [vmem:[%s3885_s16] sm:$0xff]  ;;  %v1437_v53 = vld [vmem:[%s3885_s16 + $0x8] sm:$0xff]  ;;  %v1438_v54 = vld [vmem:[%s3885_s16 + $0x10] sm:$0xff] }
 0x364   : > { %v1014_v59 = vadd.f32 %v1013_v56, %v997_v55  ;;  %v1026_v60 = vpop.permute.xlu1 %1025  ;;  %v1297_v39 = vpop.permute.xlu0 %1296  ;;  %v3537_v55 = vpack.c.bf16 %v1437_v53, %v1436_v52  ;;  %v1439_v56 = vld [vmem:[%s3885_s16 + $0x18] sm:$0xff]  ;;  %v1705_v52 = vld [vmem:[%s3888_s19 + $0x30] sm:$0xff]  ;;  %v2215_v53 = vld [vmem:[%s3887_s18] ss:$0 sm:$0xff] }
 0x365   : > { %v1028_v61 = vsel %vm1024_vm8, %v1026_v60, 0.0  ;;  %v1299_v40 = vadd.f32 %v1297_v39, %v1208_v25 }
 0x366   : > { %v1023_v62 = vadd.f32 %v1022_v58, %v1014_v59  ;;  %v1031_v63 = vmul.f32 %v1030_v57, %v1028_v61  ;;  %v3543_v59 = vpack.c.bf16 %v1439_v56, %v1438_v54  ;;  %v1440_v61 = vld [vmem:[%s3885_s16 + $0x20] sm:$0xff] }
 0x367   : > { %v2211_v42 = vmul.f32 -1.442695, %v1299_v40  ;;  %v1700_v40 = vld [vmem:[%s3888_s19 + $0x8] sm:$0xff] }
 0x368   : > { %v1032_v1 = vadd.f32 %v1031_v63, %v1023_v62  ;;  %v1307_v13 = vpop.permute.xlu1 %1306  ;;  %v1441_v62 = vld [vmem:[%s3885_s16 + $0x28] sm:$0xff] }
 0x36a   : > { %v1035_v2 = vadd.f32 %v1034_v0, %v1032_v1 }
 0x36c   : > { %v2204_v3 = vmul.f32 -1.442695, %v1035_v2  ;;  %v1312_v16 = vpop.permute.xlu1 %1311 }
 0x36e   : > { %2704 = vpow2.f32 %v2204_v3 }
 0x378   : > { %v2705_v5 = vpop.eup %2704 }
 0x379   : > { %v1039_v6 = vadd.f32 1.0, %v2705_v5  ;;  %v1442_v5 = vld [vmem:[%s3885_s16 + $0x30] sm:$0xff] }
 0x37b   : > { %2706 = vrcp.f32 %v1039_v6  ;;  %v1443_v6 = vld [vmem:[%s3885_s16 + $0x38] sm:$0xff] }
 0x385   : > { %v2707_v7 = vpop.eup %2706 }
 0x386   : > { %v1042_v8 = vmul.f32 %v2707_v7, %v1035_v2  ;;  %v2479_v2 = vpack.c.bf16 %v1441_v62, %v1440_v61 }
 0x388   : > { %2325 = vmatmul.mubr.msk.f32.vlgmr.msra.gmra.mrb[0].mxu1 %vm1137_vm4, %v1042_v8 }
 0x389   : > { %2370 = vmatprep.mubr.msk.f32.mxu1 %vm3067_vm3, %v3068_v20  ;;  %2474 = vmatpush3.bf16.msra.mxu1 %v3537_v55 }
 0x38a   : > { %2475 = vmatprep.subr.bf16.mxu1 %v3066_v14 }
 0x38d   : > { %2477 = vmatpush3.bf16.msra.mxu1 %v3543_v59 }
 0x38e   : > { %2478 = vmatprep.subr.bf16.mxu1 %v3066_v14 }
 0x391   : > { %2480 = vmatpush3.bf16.msra.mxu1 %v2479_v2 }
 0x392   : > { %2481 = vmatprep.subr.bf16.mxu1 %v3066_v14 }
 0x45b   : > { %v1289_v10 = vpop.f32.mrb[0].mxu1 }
 0x45c   : > { %v1290_v11 = vadd.f32 %v2209_v9, %v1289_v10  ;;  %v2326_v12 = vpop.f32.mrb[1].mxu1  ;;  %v2482_v10 = vpack.c.bf16 %v1443_v6, %v1442_v5  ;;  %v1827_v6 = vld [vmem:[%s3984_s29 + $0x20] sm:$0xff] }
 0x45d   : > { %v1445_v12 = vld [vmem:[%s3885_s16 + $0x48] sm:$0xff] }
 0x45e   : > { %v1309_v15 = vadd.f32 %v1307_v13, %v1290_v11  ;;  %v1444_v11 = vld [vmem:[%s3885_s16 + $0x40] sm:$0xff]  ;;  %2483 = vmatpush3.bf16.msra.mxu1 %v2482_v10 }
 0x45f   : > { %v2485_v13 = vpack.c.bf16 %v1445_v12, %v1444_v11  ;;  %2484 = vmatprep.subr.bf16.mxu1 %v3066_v14  ;;  %v1831_v12 = vld [vmem:[%s3984_s29 + $0x40] sm:$0xff] }
 0x460   : > { %1316 = vrot.lane.b32.xlu1 %v1309_v15, %s3075_s5  ;;  %v1314_v17 = vadd.f32 %v1312_v16, %v1309_v15  ;;  %v1447_v16 = vld [vmem:[%s3885_s16 + $0x58] sm:$0xff] }
 0x462   : > { %2486 = vmatpush3.bf16.msra.mxu1 %v2485_v13 }
 0x463   : > { %2487 = vmatprep.subr.bf16.mxu1 %v3066_v14 }
 0x4d2   : > { %v1317_v18 = vpop.permute.xlu1 %1316 }
 0x4d3   : > { %v1319_v19 = vmax.f32 %v1314_v17, %v1317_v18  ;;  %v1448_v18 = vld [vmem:[%s3885_s16 + $0x60] sm:$0xff] }
 0x4d5   : > { %v1327_v21 = vsub.f32 %v1314_v17, %v1319_v19  ;;  %1321 = vrot.lane.b32.xlu1 %v1319_v19, %s3074_s23  ;;  %v1449_v19 = vld [vmem:[%s3885_s16 + $0x68] sm:$0xff] }
 0x4d7   : > { %v1328_v41 = vmul.f32 1.442695, %v1327_v21  ;;  %v2491_v21 = vpack.c.bf16 %v1449_v19, %v1448_v18  ;;  %v1835_v19 = vld [vmem:[%s3984_s29 + $0x60] sm:$0xff] }
 0x4d9   : > { %1342 = vrot.lane.b32.xlu1 %v960_v22, %s3075_s5  ;;  %v1450_v22 = vld [vmem:[%s3885_s16 + $0x70] sm:$0xff] }
 0x4dd   : > { %1331 = vrot.lane.b32.xlu1 %v959_v23, %s3075_s5  ;;  %v1451_v23 = vld [vmem:[%s3885_s16 + $0x78] sm:$0xff] }
 0x4de   : > { %v2494_v24 = vpack.c.bf16 %v1451_v23, %v1450_v22  ;;  %v1837_v23 = vld [vmem:[%s3984_s29 + $0x70] sm:$0xff] }
 0x547   : > { %v1322_v26 = vpop.permute.xlu1 %1321 }
 0x548   : > { %v1324_v27 = vsub.f32 %v1309_v15, %v1322_v26  ;;  %1931 = vst.msk [vmem:[#allocation19] sm:$0xf] %vm1919_vm9, %v1322_v26  ;;  %v1446_v15 = vld [vmem:[%s3885_s16 + $0x50] sm:$0xff] }
 0x549   : > { %v2488_v17 = vpack.c.bf16 %v1447_v16, %v1446_v15  ;;  %v1833_v16 = vld [vmem:[%s3984_s29 + $0x50] sm:$0xff] }
 0x54a   : > { %v1325_v29 = vmul.f32 1.442695, %v1324_v27 }
 0x54b   : > { %v1343_v43 = vpop.permute.xlu1 %1342  ;;  %2489 = vmatpush3.bf16.msra.mxu1 %v2488_v17 }
 0x54c   : > { %2708 = vpow2.f32 %v1325_v29  ;;  %2490 = vmatprep.subr.bf16.mxu1 %v3066_v14 }
 0x54d   : > { %2710 = vtanh.f32 %v1293_v28 }
 0x54e   : > { %2712 = vpow2.f32 %v1328_v41  ;;  %v1702_v41 = vld [vmem:[%s3888_s19 + $0x18] sm:$0xff] }
 0x54f   : > { %2714 = vpow2.f32 %v2211_v42  ;;  %v1332_v51 = vpop.permute.xlu1 %1331  ;;  %2492 = vmatpush3.bf16.msra.mxu1 %v2491_v21  ;;  %v2526_v42 = vpack.c.bf16 %v1702_v41, %v1700_v40 }
 0x550   : > { %2493 = vmatprep.subr.bf16.mxu1 %v3066_v14 }
 0x553   : > { %2495 = vmatpush3.bf16.msra.mxu1 %v2494_v24 }
 0x554   : > { %2534 = vmatprep.subr.bf16.mxu1 %v3066_v14 }
 0x556   : > { %v2709_v30 = vpop.eup %2708 }
 0x557   : > { %1347 = vrot.lane.b32.xlu0 %v2709_v30, %s3075_s5  ;;  %v2711_v31 = vpop.eup %2710 }
 0x558   : > { %v1335_v32 = vmul.f32 %v2711_v31, %v2709_v30  ;;  %v2713_v44 = vpop.eup %2712 }
 0x559   : > { %v1345_v45 = vmul.f32 %v2713_v44, %v1343_v43  ;;  %v2715_v47 = vpop.eup %2714  ;;  %v1334_v58 = vmul.f32 %v2713_v44, %v1332_v51  ;;  %v1701_v43 = vld [vmem:[%s3888_s19 + $0x10] sm:$0xff]  ;;  %v1704_v44 = vld [vmem:[%s3888_s19 + $0x28] sm:$0xff]  ;;  %v1703_v51 = vld [vmem:[%s3888_s19 + $0x20] sm:$0xff] }
 0x55a   : > { %v1303_v50 = vadd.f32 1.0, %v2715_v47  ;;  %v2532_v54 = vpack.c.bf16 %v1705_v52, %v1703_v51 }
 0x55b   : > { %1337 = vrot.lane.b32.xlu0 %v1335_v32, %s3075_s5 }
 0x5c9   : > { %v1348_v48 = vpop.permute.xlu0 %1347 }
 0x5ca   : > { %v3525_v49 = vadd.f32 %v1348_v48, %v1345_v45  ;;  %v1706_v45 = vld [vmem:[%s3888_s19 + $0x38] sm:$0xff] }
 0x5cc   : > { %2716 = vrcp.f32 %v3525_v49 }
 0x5cd   : > { %2718 = vrcp.f32 %v1303_v50  ;;  %v1338_v57 = vpop.permute.xlu0 %1337  ;;  %v2530_v50 = vpack.c.bf16 %v1706_v45, %v1704_v44 }
 0x5ce   : > { %v3553_v0 = vadd.f32 %v1338_v57, %v1334_v58 }
 0x5d6   : > { %v2717_v60 = vpop.eup %2716 }
 0x5d7   : > { %v1352_v63 = vmul.f32 %v2717_v60, %v3525_v49  ;;  %v2719_v3 = vpop.eup %2718 }
 0x5d8   : > { %v1355_v7 = vmul.f32 %v2719_v3, %v3553_v0  ;;  %v1826_v3 = vld [vmem:[%s3984_s29 + $0x18] sm:$0xff] }
 0x5d9   : > { %v1353_v1 = vsub.f32 2.0, %v1352_v63 }
 0x5db   : > { %v1354_v8 = vmul.f32 %v2717_v60, %v1353_v1  ;;  %v1824_v1 = vld [vmem:[%s3984_s29 + $0x8] sm:$0xff] }
 0x5dd   : > { %v1356_v9 = vmul.f32 %v1355_v7, %v1354_v8  ;;  %v1828_v7 = vld [vmem:[%s3984_s29 + $0x28] sm:$0xff] }
 0x5de   : > { %v2541_v8 = vpack.c.bf16 %v1828_v7, %v1827_v6 }
 0x5df   : > { %1362 = vrot.lane.b32.xlu1 %v1356_v9, %s3074_s23 }
 0x651   : > { %v1363_v25 = vpop.permute.xlu1 %1362 }
 0x652   : > { %2336 = vmatmul.mubr.msk.f32.vlgmr.msra.gmra.mrb[4].mxu0 %vm1054_vm2, %v1363_v25  ;;  %1920 = vst.msk [vmem:[#allocation14] sm:$0xf] %vm1919_vm9, %v1363_v25 }
 0x653   : > { %2498 = vmatpush3.bf16.msra.mxu0 %v3514_v36  ;;  %2381 = vmatprep.mubr.msk.f32.mxu0 %vm3067_vm3, %v3068_v20  ;;  %v2214_v36 = vld [vmem:[%s3886_s17] ss:$0 sm:$0xff] }
 0x654   : > { %2499 = vmatprep.subr.bf16.mxu0 %v3066_v14 }
 0x657   : > { %2501 = vmatpush3.bf16.msra.mxu0 %v3520_v38 }
 0x658   : > { %2502 = vmatprep.subr.bf16.mxu0 %v3066_v14 }
 0x725   : > { %v1432_v26 = vpop.f32.mrb[4].mxu0 }
 0x726   : > { %v2337_v27 = vpop.f32.mrb[5].mxu0  ;;  %2371 = vmatmul.mubr.f32.vlgmr.msra.gmra.mrb[2].mxu1 %v1432_v26  ;;  %v1710_v26 = vshrl.u32 %v993_v46, 7 }
 0x727   : > { %2451 = vmatprep.mubr.msk.f32.mxu1 %vm3067_vm3, %v3068_v20 }
 0x728   : > { %v1715_v27 = vsub.s32 1, %v1710_v26  ;;  %v1711_v51 = vsub.s32 0, %v1710_v26 }
 0x7f9   : > { %v1518_v28 = vpop.f32.mrb[2].mxu1 }
 0x7fa   : > { %1523 = vrot.lane.b32.xlu0 %v1518_v28, %s3075_s5  ;;  %v2372_v29 = vpop.f32.mrb[3].mxu1  ;;  %v1707_v28 = vld [vmem:[%s3985_s2] sm:$0x3] }
 0x7fb   : > { %v1716_v29 = vrot.slane %v1707_v28, %v1715_v27 }
 0x86c   : > { %v1524_v30 = vpop.permute.xlu0 %1523 }
 0x86d   : > { %v1526_v31 = vsub.f32 %v1356_v9, %v1524_v30  ;;  %v1829_v9 = vld [vmem:[%s3984_s29 + $0x30] sm:$0xff] }
 0x86f   : > { %v1527_v32 = vmul.f32 %v1526_v31, %v1526_v31 }
 0x871   : > { %1529 = vrot.lane.b32.xlu1 %v1527_v32, %s3074_s23 }
 0x875   : > { %1685 = vrot.lane.b32.xlu1 %v2214_v36, %s3075_s5 }
 0x8e3   : > { %v1530_v33 = vpop.permute.xlu1 %1529 }
 0x8e4   : > { %2382 = vmatmul.mubr.msk.f32.vlgmr.msra.gmra.mrb[6].mxu0 %vm1054_vm2, %v1530_v33 }
 0x8e5   : > { %2504 = vmatpush3.bf16.msra.mxu0 %v3537_v55  ;;  %2416 = vmatprep.mubr.msk.f32.mxu0 %vm3067_vm3, %v3068_v20 }
 0x8e6   : > { %2505 = vmatprep.subr.bf16.mxu0 %v3066_v14 }
 0x8e7   : > { %v1686_v56 = vpop.permute.xlu1 %1685 }
 0x8e9   : > { %2507 = vmatpush3.bf16.msra.mxu0 %v3543_v59 }
 0x8ea   : > { %2508 = vmatprep.subr.bf16.mxu0 %v3066_v14 }
 0x8ed   : > { %2510 = vmatpush3.bf16.msra.mxu0 %v2479_v2 }
 0x8ee   : > { %2511 = vmatprep.subr.bf16.mxu0 %v3066_v14 }
 0x8f1   : > { %2513 = vmatpush3.bf16.msra.mxu0 %v2482_v10  ;;  %v1830_v10 = vld [vmem:[%s3984_s29 + $0x38] sm:$0xff] }
 0x8f2   : > { %2514 = vmatprep.subr.bf16.mxu0 %v3066_v14  ;;  %v2544_v11 = vpack.c.bf16 %v1830_v10, %v1829_v9 }
 0x8f5   : > { %2516 = vmatpush3.bf16.msra.mxu0 %v2485_v13  ;;  %v1832_v13 = vld [vmem:[%s3984_s29 + $0x48] sm:$0xff] }
 0x8f6   : > { %2517 = vmatprep.subr.bf16.mxu0 %v3066_v14  ;;  %v2547_v15 = vpack.c.bf16 %v1832_v13, %v1831_v12 }
 0x8f9   : > { %2519 = vmatpush3.bf16.msra.mxu0 %v2488_v17  ;;  %v1834_v17 = vld [vmem:[%s3984_s29 + $0x58] sm:$0xff] }
 0x8fa   : > { %2520 = vmatprep.subr.bf16.mxu0 %v3066_v14  ;;  %v2550_v18 = vpack.c.bf16 %v1834_v17, %v1833_v16 }
 0x8fd   : > { %2522 = vmatpush3.bf16.msra.mxu0 %v2491_v21  ;;  %v1836_v21 = vld [vmem:[%s3984_s29 + $0x68] sm:$0xff] }
 0x8fe   : > { %2523 = vmatprep.subr.bf16.mxu0 %v3066_v14  ;;  %v2553_v22 = vpack.c.bf16 %v1836_v21, %v1835_v19 }
 0x901   : > { %2525 = vmatpush3.bf16.msra.mxu0 %v2494_v24  ;;  %v1838_v24 = vld [vmem:[%s3984_s29 + $0x78] sm:$0xff] }
 0x902   : > { %2527 = vmatprep.subr.bf16.mxu0 %v2526_v42  ;;  %v2556_v25 = vpack.c.bf16 %v1838_v24, %v1837_v23 }
 0x9b7   : > { %v1599_v34 = vpop.f32.mrb[6].mxu0 }
 0x9b8   : > { %v2383_v35 = vpop.f32.mrb[7].mxu0  ;;  %2417 = vmatmul.mubr.f32.vlgmr.msra.gmra.mrb[8].mxu0 %v1599_v34 }
 0x9b9   : > { %1788 = vmatprep.mubr.f32.mxu0 %v3068_v20  ;;  %v1699_v20 = vld [vmem:[%s3888_s19] sm:$0xff] }
 0x9ba   : > { %v2528_v48 = vpack.c.bf16 %v1701_v43, %v1699_v20 }
 0x9bc   : > { %2529 = vmatpush1.bf16.msra.mxu0 %v2528_v48 }
 0x9bd   : > { %2531 = vmatprep.subr.bf16.mxu0 %v2530_v50 }
 0x9c0   : > { %2533 = vmatpush1.bf16.msra.mxu0 %v2532_v54  ;;  %v1712_v54 = vrot.slane %v1707_v28, %v1711_v51 }
 0xa8b   : > { %v1669_v37 = vpop.f32.mrb[8].mxu0 }
 0xa8c   : > { %v1670_v38 = vadd.f32 1e-05, %v1669_v37  ;;  %v2418_v39 = vpop.f32.mrb[9].mxu0 }
 0xa8e   : > { %2720 = vrsqrt.f32 %v1670_v38 }
 0xa98   : > { %v2721_v47 = vpop.eup %2720 }
 0xa99   : > { %1675 = vrot.lane.b32.xlu0 %v2721_v47, %s3075_s5 }
 0xa9d   : > { %1695 = vrot.lane.b32.xlu0 %v2215_v53, %s3075_s5  ;;  %s1986_s5 = sshll.u32 %s3077_s26, 4  ;;  %s3720_s5 = int_to_ptr.vmem [resolvable:$true] %s1986_s5 }
 0xaa1   : > { %1927 = vrot.lane.b32.xlu0 %v3525_v49, %s3074_s23  ;;  %v1823_v49 = vld [vmem:[%s3984_s29] sm:$0xff] }
 0xaa2   : > { %v2535_v2 = vpack.c.bf16 %v1824_v1, %v1823_v49 }
 0xaa4   : > { %2536 = vmatpush3.bf16.msra.mxu1 %v2535_v2 }
 0xaa5   : > { %2537 = vmatprep.subr.bf16.mxu1 %v3066_v14 }
 0xb0b   : > { %v1676_v55 = vpop.permute.xlu0 %1675 }
 0xb0c   : > { %v1678_v57 = vmul.f32 %v1676_v55, %v1526_v31 }
 0xb0e   : > { %v1688_v58 = vmul.f32 %v1686_v56, %v1678_v57 }
 0xb0f   : > { %v1696_v59 = vpop.permute.xlu0 %1695 }
 0xb10   : > { %v1698_v60 = vadd.f32 %v1696_v59, %v1688_v58 }
 0xb12   : > { %1720 = vrot.lane.b32.xlu1 %v1698_v60, %s3074_s23 }
 0xb13   : > { %v1928_v61 = vpop.permute.xlu0 %1927 }
 0xb14   : > { %1930 = vst.msk [vmem:[#allocation17] sm:$0xf] %vm1919_vm9, %v1928_v61 }
 0xb16   : > { %1922 = vrot.lane.b32.xlu1 %v3553_v0, %s3074_s23  ;;  %v1825_v0 = vld [vmem:[%s3984_s29 + $0x10] sm:$0xff] }
 0xb17   : > { %v2538_v5 = vpack.c.bf16 %v1826_v3, %v1825_v0 }
 0xb19   : > { %2539 = vmatpush3.bf16.msra.mxu1 %v2538_v5 }
 0xb1a   : > { %2540 = vmatprep.subr.bf16.mxu1 %v3066_v14 }
 0xb1d   : > { %2542 = vmatpush3.bf16.msra.mxu1 %v2541_v8 }
 0xb1e   : > { %2543 = vmatprep.subr.bf16.mxu1 %v3066_v14 }
 0xb21   : > { %2545 = vmatpush3.bf16.msra.mxu1 %v2544_v11 }
 0xb22   : > { %2546 = vmatprep.subr.bf16.mxu1 %v3066_v14 }
 0xb25   : > { %2548 = vmatpush3.bf16.msra.mxu1 %v2547_v15 }
 0xb26   : > { %2549 = vmatprep.subr.bf16.mxu1 %v3066_v14 }
 0xb29   : > { %2551 = vmatpush3.bf16.msra.mxu1 %v2550_v18 }
 0xb2a   : > { %2552 = vmatprep.subr.bf16.mxu1 %v3066_v14 }
 0xb2d   : > { %2554 = vmatpush3.bf16.msra.mxu1 %v2553_v22 }
 0xb2e   : > { %2555 = vmatprep.subr.bf16.mxu1 %v3066_v14 }
 0xb31   : > { %2557 = vmatpush3.bf16.msra.mxu1 %v2556_v25 }
 0xb84   : > { %v1721_v62 = vpop.permute.xlu1 %1720 }
 0xb85   : > { %2216 = vmatmul.mubr.msk.f32.vlgmr.msra.gmra.mrb[10].mxu0 %vm1054_vm2, %v1721_v62 }
 0xb88   : > { %v1923_v63 = vpop.permute.xlu1 %1922 }
 0xb89   : > { %1925 = vst.msk [vmem:[#allocation16] sm:$0xf] %vm1919_vm9, %v1923_v63 }
 0xc58   : > { %v1790_v30 = vpop.f32.mrb[10].mxu0 }
 0xc59   : > { %v1792_v14 = vpop.f32.mrb[11].mxu0  ;;  %v1791_v58 = vadd.f32 %v1790_v30, %v1712_v54 }
 0xc5a   : > { %v1793_v31 = vadd.f32 %v1792_v14, %v1716_v29 }
 0xc5c   : > { %v1796_v32 = vmul.f32 0.70710677, %v1793_v31  ;;  %v1795_v56 = vmul.f32 0.5, %v1793_v31 }
 0xc5e   : > { %v1797_v33 = vand.u32 2147483647, %v1796_v32  ;;  %vm1817_vm10 = vcmp.ge.f32.partialorder %v1796_v32, 0.0 }
 0xc60   : > { %v1798_v34 = vmul.f32 0.3275911, %v1797_v33  ;;  %v1811_v36 = vsub.f32 0.0, %v1797_v33 }
 0xc62   : > { %v1799_v35 = vadd.f32 1.0, %v1798_v34  ;;  %v1812_v38 = vmul.f32 %v1811_v36, %v1797_v33 }
 0xc64   : > { %2722 = vrcp.f32 %v1799_v35  ;;  %v1813_v46 = vmul.f32 1.442695, %v1812_v38 }
 0xc66   : > { %2724 = vpow2.f32 %v1813_v46 }
 0xc6e   : > { %v2723_v37 = vpop.eup %2722 }
 0xc6f   : > { %v1802_v39 = vmul.f32 1.0614054, %v2723_v37 }
 0xc70   : > { %v2725_v48 = vpop.eup %2724 }
 0xc71   : > { %v1803_v40 = vadd.f32 -1.4531521, %v1802_v39 }
 0xc73   : > { %v1804_v41 = vmul.f32 %v2723_v37, %v1803_v40 }
 0xc75   : > { %v1805_v20 = vadd.f32 1.4214138, %v1804_v41 }
 0xc77   : > { %v1806_v42 = vmul.f32 %v2723_v37, %v1805_v20 }
 0xc79   : > { %v1807_v43 = vadd.f32 -0.28449672, %v1806_v42 }
 0xc7b   : > { %v1808_v44 = vmul.f32 %v2723_v37, %v1807_v43 }
 0xc7d   : > { %v1809_v45 = vadd.f32 0.2548296, %v1808_v44 }
 0xc7f   : > { %v1810_v47 = vmul.f32 %v2723_v37, %v1809_v45 }
 0xc81   : > { %v1815_v50 = vmul.f32 %v2725_v48, %v1810_v47 }
 0xc83   : > { %v1816_v52 = vsub.f32 1.0, %v1815_v50 }
 0xc85   : > { %v1818_v53 = vsub.f32 0.0, %v1816_v52 }
 0xc87   : > { %v1819_v55 = vsel %vm1817_vm10, %v1816_v52, %v1818_v53 }
 0xc88   : > { %v1820_v57 = vadd.f32 1.0, %v1819_v55 }
 0xc8a   : > { %v1821_v59 = vmul.f32 %v1820_v57, %v1795_v56 }
 0xc8c   : > { %v1822_v60 = vmul.f32 %v1821_v59, %v1791_v58 }
 0xc8e   : > { %2452 = vmatmul.mubr.f32.vlgmr.msra.gmra.mrb[4].mxu1 %v1822_v60 }
 0xc8f   : > { %2866 = shalt.err (!%p2863_p8)
}
 0xc90   : > { %s3988_s24 = sld [smem:[#allocation52_spill]] }
 0xc96   : > { %s2867_s23 = scalar_lea.hbm %s3988_s24, 64 }
 0xc97   : > { %p2868_p10 = scmp.ne.s32.totalorder %s3988_s24, %s2867_s23  ;;  %p2873_p6 = scmp.lt.u32.totalorder %s2867_s23, %s3988_s24 }
 0xc99   : > { %p2869_p11 = pnand %p2868_p10, %p3987_p9 }
 0xc9b   : > { %p2870_p5 = pneg %p2869_p11 }
 0xc9d   : > { %p2875_p13 = pnand %p2873_p6, %p2870_p5 }
 0xc9f   : > { %2878 = shalt.err (!%p2875_p13)
}
 0xca0   : > { %2580 = dma.vmem_to_hbm [thread:$0]  (%p3987_p9), %s1961_s10, 64, %s3988_s24, [#allocation15]  }
 0xca1   : > { %s2879_s25 = scalar_lea.vmem %s3720_s5, 64  ;;  %p2886_p0 = scmp.lt.s32.totalorder %s3720_s5, %s3720_s5 }
 0xca2   : > { %p2880_p1 = scmp.ne.s32.totalorder %s3720_s5, %s2879_s25  ;;  %p2887_p3 = scmp.lt.s32.totalorder %s2879_s25, %s2879_s25 }
 0xca4   : > { %p2881_p7 = pnand %p2880_p1, %p3987_p9  ;;  %p2888_p2 = por %p2887_p3, %p2886_p0 }
 0xca6   : > { %p2882_p12 = pneg %p2881_p7 }
 0xca8   : > { %p2889_p4 = pnand %p2888_p2, %p2882_p12 }
 0xcaa   : > { %2892 = shalt.err (!%p2889_p4)
}
 0xcab   : > { %s3989_s3 = sld [smem:[#allocation54_spill]] }
 0xcb1   : > { %s2893_s8 = scalar_lea.hbm %s3989_s3, 64 }
 0xcb2   : > { %p2894_p8 = scmp.ne.s32.totalorder %s3989_s3, %s2893_s8  ;;  %p2899_p5 = scmp.lt.u32.totalorder %s2893_s8, %s3989_s3 }
 0xcb4   : > { %p2895_p10 = pnand %p2894_p8, %p3987_p9 }
 0xcb6   : > { %p2896_p11 = pneg %p2895_p10 }
 0xcb8   : > { %p2901_p6 = pnand %p2899_p5, %p2896_p11 }
 0xcba   : > { %2904 = shalt.err (!%p2901_p6)
}
 0xcbb   : > { %2584 = dma.vmem_to_hbm [thread:$0]  (%p3987_p9), %s3720_s5, 64, %s3989_s3, [#allocation18]  }
 0xcbc   : > { %s3078_s0 = smov [#allocation16]   ;;  %s3079_s2 = smov [#allocation19]  }
 0xcbd   : > { %s1973_s23 = sshll.u32 %s3078_s0, 4  ;;  %s1999_s20 = sshll.u32 %s3079_s2, 4  ;;  %s1974_s23 = int_to_ptr.vmem [resolvable:$true] %s1973_s23  ;;  %s2000_s20 = int_to_ptr.vmem [resolvable:$true] %s1999_s20 }
 0xcbe   : > { %s2905_s30 = scalar_lea.vmem %s1974_s23, 64  ;;  %p2912_p12 = scmp.lt.s32.totalorder %s1974_s23, %s1974_s23 }
 0xcbf   : > { %p2906_p13 = scmp.ne.s32.totalorder %s1974_s23, %s2905_s30  ;;  %p2913_p0 = scmp.lt.s32.totalorder %s2905_s30, %s2905_s30 }
 0xcc1   : > { %p2907_p1 = pnand %p2906_p13, %p3987_p9  ;;  %p2914_p3 = por %p2913_p0, %p2912_p12 }
 0xcc3   : > { %p2908_p7 = pneg %p2907_p1 }
 0xcc5   : > { %p2915_p2 = pnand %p2914_p3, %p2908_p7 }
 0xcc7   : > { %2918 = shalt.err (!%p2915_p2)
}
 0xcc8   : > { %s3990_s26 = sld [smem:[#allocation53_spill]] }
 0xcce   : > { %s2919_s5 = scalar_lea.hbm %s3990_s26, 64 }
 0xccf   : > { %p2920_p4 = scmp.ne.s32.totalorder %s3990_s26, %s2919_s5  ;;  %p2925_p11 = scmp.lt.u32.totalorder %s2919_s5, %s3990_s26 }
 0xcd1   : > { %p2921_p8 = pnand %p2920_p4, %p3987_p9 }
 0xcd3   : > { %p2922_p10 = pneg %p2921_p8 }
 0xcd5   : > { %p2927_p5 = pnand %p2925_p11, %p2922_p10 }
 0xcd7   : > { %2930 = shalt.err (!%p2927_p5)
}
 0xcd8   : > { %2582 = dma.vmem_to_hbm [thread:$0]  (%p3987_p9), %s1974_s23, 64, %s3990_s26, [#allocation15]  }
 0xcd9   : > { %s2931_s8 = scalar_lea.vmem %s2000_s20, 64  ;;  %p2938_p7 = scmp.lt.s32.totalorder %s2000_s20, %s2000_s20 }
 0xcda   : > { %p2932_p6 = scmp.ne.s32.totalorder %s2000_s20, %s2931_s8  ;;  %p2939_p12 = scmp.lt.s32.totalorder %s2931_s8, %s2931_s8 }
 0xcdc   : > { %p2933_p13 = pnand %p2932_p6, %p3987_p9  ;;  %p2940_p0 = por %p2939_p12, %p2938_p7 }
 0xcde   : > { %p2934_p1 = pneg %p2933_p13 }
 0xce0   : > { %p2941_p3 = pnand %p2940_p0, %p2934_p1 }
 0xce2   : > { %2944 = shalt.err (!%p2941_p3)
}
 0xce3   : > { %s3991_s27 = sld [smem:[#allocation55_spill]] }
 0xce9   : > { %s2945_s25 = scalar_lea.hbm %s3991_s27, 64 }
 0xcea   : > { %p2946_p2 = scmp.ne.s32.totalorder %s3991_s27, %s2945_s25  ;;  %p2951_p10 = scmp.lt.u32.totalorder %s2945_s25, %s3991_s27 }
 0xcec   : > { %p2947_p4 = pnand %p2946_p2, %p3987_p9 }
 0xcee   : > { %p2948_p8 = pneg %p2947_p4 }
 0xcf0   : > { %p2953_p11 = pnand %p2951_p10, %p2948_p8 }
 0xcf2   : > { %2956 = shalt.err (!%p2953_p11)
}
 0xcf3   : > { %s3992_s10 = sld [smem:[#allocation33_spill]]  ;;  %s3993_s11 = sld [smem:[#allocation50_spill]] }
 0xcf4   : > { %2586 = dma.vmem_to_hbm [thread:$0]  (%p3987_p9), %s2000_s20, 64, %s3991_s27, [#allocation18]  }
 0xcf5   : > { %s2219_s23 = sshll.u32 %s3051_s28, 6  ;;  %s3994_s25 = scalar_lea.vmem [#allocation13], %s3415_s6 }
 0xcf6   : > { %s1947_s2 = sshll.u32 %s3994_s25, 4  ;;  %s3995_s8 = sld [smem:[#allocation51_spill]]  ;;  %s3811_s2 = int_to_ptr.vmem [resolvable:$true] %s1947_s2 }
 0xcf7   : > { %s3996_s20 = smov %s3994_s25  ;;  %s3997_s28 = sand.u32 1, %s3043_s9  }
 0xcf8   : > { %s1933_s5 = scalar_lea.sflag [#allocation5], %s3997_s28  ;;  %s2957_s0 = scalar_lea.vmem %s3811_s2, 64 }
 0xcf9   : > { %v2217_v61 = vld [vmem:[%s3993_s11] ss:$0 sm:$0xff]  ;;  %p2958_p5 = scmp.ne.s32.totalorder %s3811_s2, %s2957_s0  ;;  %p3998_p6 = scmp.ne.s32.totalorder %s3992_s10, 0 }
 0xcfa   : > { %s3080_s11 = smov [#allocation13]  }
 0xcfb   : > { %p2959_p13 = pnand %p2958_p5, %p3998_p6  ;;  %s2961_s25 = sshll.u32 %s3080_s11, 4  ;;  %s2962_s25 = int_to_ptr.vmem [resolvable:$false] %s2961_s25 }
 0xcfc   : > { %s3809_s3 = scalar_lea.hbm %s3995_s8, %s2219_s23  ;;  %s2963_s1 = scalar_lea.vmem %s2962_s25, 128 }
 0xcfd   : > { %p2960_p1 = pneg %p2959_p13  ;;  %p2964_p7 = scmp.lt.s32.totalorder %s3811_s2, %s2962_s25 }
 0xcfe   : > { %p2965_p12 = scmp.lt.s32.totalorder %s2963_s1, %s2957_s0 }
 0xd00   : > { %p2966_p0 = por %p2965_p12, %p2964_p7 }
 0xd02   : > { %p2967_p3 = pnand %p2966_p0, %p2960_p1 }
 0xd61   : > { %v1912_v62 = vpop.f32.mrb[4].mxu1 }
 0xd62   : > { %v1913_v63 = vadd.f32 %v2217_v61, %v1912_v62  ;;  %v2453_v49 = vpop.f32.mrb[5].mxu1 }
 0xd64   : > { %v1916_v1 = vadd.f32 %v1913_v63, %v3423_v4 }
 0xd66   : > { %1917 = vst.msk [vmem:[%s3996_s20] sm:$0xf] %vm962_vm1, %v1916_v1 }
 0xd67   : > { %2970 = shalt.err (!%p2967_p3)
}
 0xd68   : > { %s2971_s6 = scalar_lea.hbm %s3809_s3, 64  ;;  %s2975_s20 = scalar_lea.hbm %s3995_s8, 384 }
 0xd69   : > { %p2972_p2 = scmp.ne.s32.totalorder %s3809_s3, %s2971_s6  ;;  %p2976_p10 = scmp.lt.u32.totalorder %s3809_s3, %s3995_s8 }
 0xd6a   : > { %p2977_p11 = scmp.lt.u32.totalorder %s2975_s20, %s2971_s6  ;;  %p2979_p13 = scmp.lt.u32.totalorder %s2971_s6, %s3809_s3 }
 0xd6b   : > { %p2973_p4 = pnand %p2972_p2, %p3998_p6 }
 0xd6c   : > { %p2978_p5 = por %p2977_p11, %p2976_p10 }
 0xd6d   : > { %p2974_p8 = pneg %p2973_p4 }
 0xd6e   : > { %p2980_p1 = por %p2979_p13, %p2978_p5 }
 0xd70   : > { %p2981_p7 = pnand %p2980_p1, %p2974_p8 }
 0xd72   : > { %2984 = shalt.err (!%p2981_p7)
}
 0xd73   : > { %2578 = dma.vmem_to_hbm [thread:$0]  (%p3998_p6), %s3811_s2, 64, %s3809_s3, %s1933_s5  }
 0xd74   : > { %3026 = dma.done.wait (%p3987_p9), [#allocation15], 128  }
 0xd75   : > { %3028 = vsyncadd (%p3987_p9), [#allocation15], 4294967168 }
 0xd76   : > { %3030 = dma.done.wait (%p3987_p9), [#allocation18], 128  }
 0xd77   : > { %3032 = vsyncadd (%p3987_p9), [#allocation18], 4294967168 }
 0xd78 PF: > { %s3999_s0 = sld [smem:[#allocation30_spill]]  ;;  %s4000_s25 = sld [smem:[#allocation27_spill]] }
 0xd79   : > { %s4001_s1 = sld [smem:[#allocation34_spill]] }
 0xd7e   : > { %p2634_p12 = scmp.ge.s32.totalorder %s3999_s0, 2  ;;  %s2027_s10 = sand.u32 1, %s4000_s25  }
 0xd7f   : > { %p4002_p0 = scmp.ne.s32.totalorder %s4001_s1, 0  ;;  %s2028_s3 = scalar_lea.sflag [#allocation5], %s2027_s10 }
 0xd81   : > { %p2613_p3 = pnand %p2634_p12, %p4002_p0 }
 0xd83   : > { %3034 = dma.done.wait (!%p2613_p3), %s2028_s3, 64  }
 0xd84   : > { %3036 = vsyncadd (!%p2613_p3), %s2028_s3, 4294967232  ;;  %s48_s10 = sadd.s32 1, %s3999_s0   ;;  %s4003_s2 = sld [smem:[#allocation28_spill]] }
 0xd85   : > { %p45_p6 = scmp.ge.s32.totalorder %s48_s10, 8   ;;  %s4004_s5 = sld [smem:[#allocation35_spill]] }
 0xd86   : > { %s4005_s28 = sld [smem:[#allocation29_spill]]  ;;  %s4006_s0 = sld [smem:[#allocation32_spill]] }
 0xd87   : > { %s4007_s30 = smov %s3043_s9  ;;  %47 = sbr.rel (!%p45_p6) target bundleno = 32 (0x20), region = 213 }
 0xd8a   : > { %s4008_s9 = smov %s4003_s2 }
 0xd8e   :  { %2033 = vsyncpa [#allocation4], 1 }
 0xd8f   :  { %2035 = vsyncpa [#allocation4 + $0x1], 1 }
 0xd90   :  { %2036 = vsyncpa [#allocation8], 1 }
 0xd91   :  { %2037 = vsyncpa [#allocation11], 1 }
 0xd92   :  { %2038 = vsyncpa [#allocation5], 1 }
 0xd93   :  { %2040 = vsyncpa [#allocation5 + $0x1], 1 }
 0xd94   :  { %2041 = vsyncpa [#allocation15], 1 }
 0xd95   :  { %2042 = vsyncpa [#allocation18], 1 }
 0xd96   :  { %2043 = vsyncpa [#allocation6], 1 }
 0xd97   :  { %2045 = vsyncpa [#allocation6 + $0x1], 1 }

</bundles_post_ra>
